<compile_context>
chip_gen: v7x
topology: tpu7x:2x2x1
jax: 0.10.0
libtpu: 0.0.40
codegen_flags: <defaults>
</compile_context>

<pallas_src>
import jax
import jax.numpy as jnp
from jax.experimental import pallas as pl
from jax.experimental.pallas import tpu as pltpu

_EPS = 1e-3


def _fused_kernel(x_ref, s_ref, w1_ref, w2_ref, g_ref, bt_ref, mu_ref, vr_ref,
                  o_ref):
    # x_ref:  [256, 196]  input pixels, channel-major (Cin sublanes, HW lanes)
    # s_ref:  [256, 1]    x76 per-channel multiplier
    # w1_ref: [128, 256]  conv2d23 weight
    # w2_ref: [512, 128]  conv2d24 weight
    # g/bt/mu/vr_ref: [128, 1]  BatchNorm gamma / beta / running_mean / running_var
    # o_ref:  [512, 196]
    x = s_ref[...] * x_ref[...]                                    # VPU, hidden under DMA
    h = jnp.dot(w1_ref[...], x, preferred_element_type=jnp.float32)  # [128, 196]
    a = g_ref[...] * jax.lax.rsqrt(vr_ref[...] + _EPS)             # [128, 1] (EUP)
    b = bt_ref[...] - mu_ref[...] * a                              # [128, 1]
    h = h * a + b                                                  # eval-mode BatchNorm
    o_ref[...] = jnp.dot(w2_ref[...], h, preferred_element_type=jnp.float32)


@jax.jit
def fused_mul_conv_bn_conv(x71, x76, w1, w2, gamma, beta, run_mean, run_var):
    # x71: [1, 256, 14, 14], x76: [1, 256, 1, 1]
    N, C_in, H, W = x71.shape
    assert N == 1  # folding x76 along Cin is only valid for batch 1
    HW = H * W
    C_mid = w1.shape[0]
    C_out = w2.shape[0]

    # Free reshapes only -- no transposes, no elementwise XLA ops.
    x_mat = x71.reshape(C_in, HW)            # [256, 196]
    s_col = x76.reshape(C_in, 1)             # [256, 1]
    w1_mat = w1.reshape(C_mid, C_in)         # [128, 256]
    w2_mat = w2.reshape(C_out, C_mid)        # [512, 128]
    g_col = gamma.reshape(C_mid, 1)
    bt_col = beta.reshape(C_mid, 1)
    mu_col = run_mean.reshape(C_mid, 1)
    vr_col = run_var.reshape(C_mid, 1)

    flops = 2 * C_mid * C_in * HW + 2 * C_out * C_mid * HW          # ~38.5 MFLOP
    bytes_accessed = 4 * (C_in * HW + C_mid * C_in + C_out * C_mid
                          + C_out * HW + C_in + 4 * C_mid)          # ~1.0 MB

    vmem = pl.BlockSpec(memory_space=pltpu.MemorySpace.VMEM)
    out_mat = pl.pallas_call(
        _fused_kernel,
        out_shape=jax.ShapeDtypeStruct((C_out, HW), jnp.float32),
        in_specs=[vmem] * 8,
        out_specs=vmem,
        cost_estimate=pl.CostEstimate(
            flops=flops, transcendentals=C_mid, bytes_accessed=bytes_accessed),
    )(x_mat, s_col, w1_mat, w2_mat, g_col, bt_col, mu_col, vr_col)

    # [512, 196] -> [1, 512, 14, 14] (free reshape).
    return out_mat.reshape(1, C_out, H, W)


def _reference(x71, x76, w1, w2, gamma, beta, run_mean, run_var, eps=_EPS):
    x77 = x76 * x71
    x78 = jax.lax.conv_general_dilated(x77, w1, (1, 1), "VALID",
                                       dimension_numbers=("NCHW", "OIHW", "NCHW"))
    a = gamma / jnp.sqrt(run_var + eps)
    b = beta - run_mean * a
    x79 = x78 * a.reshape(1, -1, 1, 1) + b.reshape(1, -1, 1, 1)
    x80 = jax.lax.conv_general_dilated(x79, w2, (1, 1), "VALID",
                                       dimension_numbers=("NCHW", "OIHW", "NCHW"))
    return x80


if __name__ == "__main__":
    key = jax.random.PRNGKey(0)
    k = jax.random.split(key, 8)

    # Shapes fixed by the module definition.
    x71 = jax.random.normal(k[0], (1, 256, 14, 14), dtype=jnp.float32)
    x76 = jax.random.normal(k[1], (1, 256, 1, 1), dtype=jnp.float32)

    # Deterministic parameter init (synthetic, not a checkpoint).
    w1 = 0.05 * jax.random.normal(k[2], (128, 256, 1, 1), dtype=jnp.float32)   # conv2d23
    w2 = 0.05 * jax.random.normal(k[3], (512, 128, 1, 1), dtype=jnp.float32)   # conv2d24
    gamma = 1.0 + 0.1 * jax.random.normal(k[4], (128,), dtype=jnp.float32)
    beta = 0.1 * jax.random.normal(k[5], (128,), dtype=jnp.float32)
    run_mean = 0.1 * jax.random.normal(k[6], (128,), dtype=jnp.float32)
    run_var = jnp.abs(jax.random.normal(k[7], (128,), dtype=jnp.float32)) + 0.5

    out = fused_mul_conv_bn_conv(x71, x76, w1, w2, gamma, beta, run_mean, run_var)
    out = jax.block_until_ready(out)

    ref = _reference(x71, x76, w1, w2, gamma, beta, run_mean, run_var)
    assert out.shape == (1, 512, 14, 14)
    assert jnp.allclose(out, ref, atol=1e-3, rtol=1e-3)

    print("KERNEL_OK")
</pallas_src>

<mosaic_0001>
module attributes {stable_mosaic.version = 11 : i64} {
  func.func @_fused_kernel(%arg0: memref<256x196xf32, #tpu.memory_space<vmem>>, %arg1: memref<256x1xf32, #tpu.memory_space<vmem>>, %arg2: memref<128x256xf32, #tpu.memory_space<vmem>>, %arg3: memref<512x128xf32, #tpu.memory_space<vmem>>, %arg4: memref<128x1xf32, #tpu.memory_space<vmem>>, %arg5: memref<128x1xf32, #tpu.memory_space<vmem>>, %arg6: memref<128x1xf32, #tpu.memory_space<vmem>>, %arg7: memref<128x1xf32, #tpu.memory_space<vmem>>, %arg8: memref<512x196xf32, #tpu.memory_space<vmem>>) attributes {dimension_semantics = [], scalar_prefetch = 0 : i64, scratch_operands = 0 : i64, tpu.core_type = #tpu.core_type<tc>} {
    %c0 = arith.constant 0 : index
    %c0_0 = arith.constant 0 : index
    %0 = vector.load %arg1[%c0, %c0_0] : memref<256x1xf32, #tpu.memory_space<vmem>>, vector<256x1xf32>
    %c0_1 = arith.constant 0 : index
    %c0_2 = arith.constant 0 : index
    %1 = vector.load %arg0[%c0_1, %c0_2] : memref<256x196xf32, #tpu.memory_space<vmem>>, vector<256x196xf32>
    %2 = vector.broadcast %0 : vector<256x1xf32> to vector<256x196xf32>
    %3 = arith.mulf %2, %1 : vector<256x196xf32>
    %c0_3 = arith.constant 0 : index
    %c0_4 = arith.constant 0 : index
    %4 = vector.load %arg2[%c0_3, %c0_4] : memref<128x256xf32, #tpu.memory_space<vmem>>, vector<128x256xf32>
    %cst = arith.constant dense<0.000000e+00> : vector<128x196xf32>
    %5 = tpu.matmul %4, %3, %cst {dimension_numbers = #tpu.dot_dimension_numbers<[1], [0], [0], [1], [0, 0, 1, 1], [], []>} : vector<128x256xf32>, vector<256x196xf32>, vector<128x196xf32> -> vector<128x196xf32>
    %c0_5 = arith.constant 0 : index
    %c0_6 = arith.constant 0 : index
    %6 = vector.load %arg4[%c0_5, %c0_6] : memref<128x1xf32, #tpu.memory_space<vmem>>, vector<128x1xf32>
    %c0_7 = arith.constant 0 : index
    %c0_8 = arith.constant 0 : index
    %7 = vector.load %arg7[%c0_7, %c0_8] : memref<128x1xf32, #tpu.memory_space<vmem>>, vector<128x1xf32>
    %cst_9 = arith.constant 1.000000e-03 : f32
    %8 = vector.broadcast %cst_9 : f32 to vector<128x1xf32>
    %9 = arith.addf %7, %8 : vector<128x1xf32>
    %10 = math.rsqrt %9 : vector<128x1xf32>
    %11 = arith.mulf %6, %10 : vector<128x1xf32>
    %c0_10 = arith.constant 0 : index
    %c0_11 = arith.constant 0 : index
    %12 = vector.load %arg5[%c0_10, %c0_11] : memref<128x1xf32, #tpu.memory_space<vmem>>, vector<128x1xf32>
    %c0_12 = arith.constant 0 : index
    %c0_13 = arith.constant 0 : index
    %13 = vector.load %arg6[%c0_12, %c0_13] : memref<128x1xf32, #tpu.memory_space<vmem>>, vector<128x1xf32>
    %14 = arith.mulf %13, %11 : vector<128x1xf32>
    %15 = arith.subf %12, %14 : vector<128x1xf32>
    %16 = vector.broadcast %11 : vector<128x1xf32> to vector<128x196xf32>
    %17 = arith.mulf %5, %16 : vector<128x196xf32>
    %18 = vector.broadcast %15 : vector<128x1xf32> to vector<128x196xf32>
    %19 = arith.addf %17, %18 : vector<128x196xf32>
    %c0_14 = arith.constant 0 : index
    %c0_15 = arith.constant 0 : index
    %20 = vector.load %arg3[%c0_14, %c0_15] : memref<512x128xf32, #tpu.memory_space<vmem>>, vector<512x128xf32>
    %cst_16 = arith.constant dense<0.000000e+00> : vector<512x196xf32>
    %21 = tpu.matmul %20, %19, %cst_16 {dimension_numbers = #tpu.dot_dimension_numbers<[1], [0], [0], [1], [0, 0, 1, 1], [], []>} : vector<512x128xf32>, vector<128x196xf32>, vector<512x196xf32> -> vector<512x196xf32>
    %c0_17 = arith.constant 0 : index
    %c0_18 = arith.constant 0 : index
    %22 = vector.load %arg8[%c0_17, %c0_18] : memref<512x196xf32, #tpu.memory_space<vmem>>, vector<512x196xf32>
    tpu.vector_store %arg8[%c0_17, %c0_18], %21 {strides = array<i32>} : memref<512x196xf32, #tpu.memory_space<vmem>>, vector<512x196xf32>,
    return
  }
}

</mosaic_0001>

<bundles_post_ra>
// kernel: fused_mul_conv_bn_conv.1
= control target key start
LH: loop header
LB: loop body
LE: loop exit
PB: predicated region body
PF: predicated region fallthrough
CT: control target
= control target key end

     0   :  { %v1704_v0 = vmov 0   ;;  %vm1424_vm0 = vcmask 556032   ;;  %s3031_s1 = inlined_call_operand.vmem [shape: f32[256,1], index: 1, kind: input, shape index: {}]   ;;  %s3032_s7 = inlined_call_operand.vmem [shape: f32[128,1], index: 7, kind: input, shape index: {}]   ;;  %s3033_s4 = inlined_call_operand.vmem [shape: f32[128,1], index: 4, kind: input, shape index: {}]   ;;  %s3034_s6 = inlined_call_operand.vmem [shape: f32[128,1], index: 6, kind: input, shape index: {}]   ;;  %s3035_s5 = inlined_call_operand.vmem [shape: f32[128,1], index: 5, kind: input, shape index: {}]   ;;  %s3036_s2 = inlined_call_operand.vmem [shape: f32[128,256], index: 2, kind: input, shape index: {}]   ;;  %s3037_s0 = inlined_call_operand.vmem [shape: f32[256,196], index: 0, kind: input, shape index: {}]   ;;  %s3038_s3 = inlined_call_operand.vmem [shape: f32[512,128], index: 3, kind: input, shape index: {}]   ;;  %s3039_s8 = inlined_call_operand.vmem [shape: f32[512,196], index: 8, kind: output, shape index: {}]  }
   0x1   :  { %1671 = vset.pattern.permute.xlu1 %v1704_v0  ;;  %1670 = vset.pattern.permute.xlu0 %v1704_v0  ;;  %v31_v1 = vld [vmem:[%s3031_s1 + $0x10] sm:$0xff]  ;;  %v29_v2 = vld [vmem:[%s3031_s1] sm:$0xff]  ;;  %v32_v3 = vld [vmem:[%s3031_s1 + $0x18] sm:$0xff] }
   0x2   :  { %137 = vperm.xlu1 %1671, %v31_v1   ;;  %127 = vperm.xlu0 %1670, %v29_v2   ;;  %v30_v4 = vld [vmem:[%s3031_s1 + $0x8] sm:$0xff]  ;;  %v33_v6 = vld [vmem:[%s3031_s1 + $0x20] sm:$0xff]  ;;  %v36_v7 = vld [vmem:[%s3031_s1 + $0x38] sm:$0xff] }
   0x3   :  { %v34_v5 = vld [vmem:[%s3031_s1 + $0x28] sm:$0xff]  ;;  %v35_v8 = vld [vmem:[%s3031_s1 + $0x30] sm:$0xff]  ;;  %v37_v10 = vld [vmem:[%s3031_s1 + $0x40] sm:$0xff] }
   0x4   :  { %v38_v9 = vld [vmem:[%s3031_s1 + $0x48] sm:$0xff]  ;;  %v40_v11 = vld [vmem:[%s3031_s1 + $0x58] sm:$0xff]  ;;  %v39_v12 = vld [vmem:[%s3031_s1 + $0x50] sm:$0xff] }
   0x5   :  { %v42_v13 = vld [vmem:[%s3031_s1 + $0x68] sm:$0xff]  ;;  %v41_v14 = vld [vmem:[%s3031_s1 + $0x60] sm:$0xff]  ;;  %v44_v15 = vld [vmem:[%s3031_s1 + $0x78] sm:$0xff] }
   0x6   :  { %142 = vperm.xlu1 %1671, %v32_v3   ;;  %132 = vperm.xlu0 %1670, %v30_v4   ;;  %v43_v16 = vld [vmem:[%s3031_s1 + $0x70] sm:$0xff]  ;;  %v46_v17 = vld [vmem:[%s3031_s1 + $0x88] sm:$0xff]  ;;  %v45_v18 = vld [vmem:[%s3031_s1 + $0x80] sm:$0xff] }
   0x7   :  { %v48_v19 = vld [vmem:[%s3031_s1 + $0x98] sm:$0xff]  ;;  %v47_v20 = vld [vmem:[%s3031_s1 + $0x90] sm:$0xff]  ;;  %v559_v21 = vld [vmem:[%s3032_s7 + $0x8] sm:$0xff] }
   0x8   :  { %v558_v22 = vld [vmem:[%s3032_s7] sm:$0xff]  ;;  %v50_v23 = vld [vmem:[%s3031_s1 + $0xa8] sm:$0xff]  ;;  %v575_v25 = vadd.f32 0.001, %v559_v21  ;;  %v52_v27 = vld [vmem:[%s3031_s1 + $0xb8] sm:$0xff] }
   0x9   :  { %v49_v24 = vld [vmem:[%s3031_s1 + $0xa0] sm:$0xff]  ;;  %v574_v26 = vadd.f32 0.001, %v558_v22  ;;  %v51_v28 = vld [vmem:[%s3031_s1 + $0xb0] sm:$0xff]  ;;  %v561_v29 = vld [vmem:[%s3032_s7 + $0x18] sm:$0xff] }
   0xa   :  { %152 = vperm.xlu1 %1671, %v34_v5   ;;  %147 = vperm.xlu0 %1670, %v33_v6   ;;  %1672 = vrsqrt.f32 %v575_v25  ;;  %v560_v30 = vld [vmem:[%s3032_s7 + $0x10] sm:$0xff]  ;;  %v54_v31 = vld [vmem:[%s3031_s1 + $0xc8] sm:$0xff]  ;;  %v53_v32 = vld [vmem:[%s3031_s1 + $0xc0] sm:$0xff]  ;;  %v577_v33 = vadd.f32 0.001, %v561_v29 }
   0xb   :  { %1674 = vrsqrt.f32 %v574_v26  ;;  %v576_v34 = vadd.f32 0.001, %v560_v30  ;;  %v56_v35 = vld [vmem:[%s3031_s1 + $0xd8] sm:$0xff]  ;;  %v55_v36 = vld [vmem:[%s3031_s1 + $0xd0] sm:$0xff]  ;;  %v563_v37 = vld [vmem:[%s3032_s7 + $0x28] sm:$0xff] }
   0xc   :  { %1676 = vrsqrt.f32 %v577_v33  ;;  %v58_v39 = vld [vmem:[%s3031_s1 + $0xe8] sm:$0xff]  ;;  %v562_v40 = vld [vmem:[%s3032_s7 + $0x20] sm:$0xff]  ;;  %v579_v45 = vadd.f32 0.001, %v563_v37  ;;  %v60_v47 = vld [vmem:[%s3031_s1 + $0xf8] sm:$0xff] }
   0xd   :  { %1678 = vrsqrt.f32 %v576_v34  ;;  %v57_v42 = vld [vmem:[%s3031_s1 + $0xe0] sm:$0xff]  ;;  %v543_v43 = vld [vmem:[%s3033_s4 + $0x8] sm:$0xff]  ;;  %v578_v46 = vadd.f32 0.001, %v562_v40  ;;  %v59_v50 = vld [vmem:[%s3031_s1 + $0xf0] sm:$0xff] }
   0xe   :  { %162 = vperm.xlu1 %1671, %v36_v7   ;;  %157 = vperm.xlu0 %1670, %v35_v8   ;;  %v542_v44 = vld [vmem:[%s3033_s4] sm:$0xff]  ;;  %v639_v51 = vld [vmem:[%s3034_s6 + $0x8] sm:$0xff]  ;;  %1680 = vrsqrt.f32 %v579_v45  ;;  %v565_v53 = vld [vmem:[%s3032_s7 + $0x38] sm:$0xff] }
   0xf   :  { %v638_v52 = vld [vmem:[%s3034_s6] sm:$0xff]  ;;  %1682 = vrsqrt.f32 %v578_v46  ;;  %v545_v57 = vld [vmem:[%s3033_s4 + $0x18] sm:$0xff]  ;;  %v564_v58 = vld [vmem:[%s3032_s7 + $0x30] sm:$0xff]  ;;  %v581_v63 = vadd.f32 0.001, %v565_v53 }
  0x10   :  { %v623_v60 = vld [vmem:[%s3035_s5 + $0x8] sm:$0xff]  ;;  %v622_v61 = vld [vmem:[%s3035_s5] sm:$0xff]  ;;  %v544_v62 = vld [vmem:[%s3033_s4 + $0x10] sm:$0xff]  ;;  %v580_v1 = vadd.f32 0.001, %v564_v58 }
  0x11   :  { %v641_v5 = vld [vmem:[%s3034_s6 + $0x18] sm:$0xff]  ;;  %v640_v6 = vld [vmem:[%s3034_s6 + $0x10] sm:$0xff]  ;;  %1684 = vrsqrt.f32 %v581_v63  ;;  %v567_v7 = vld [vmem:[%s3032_s7 + $0x48] sm:$0xff] }
  0x12   :  { %172 = vperm.xlu1 %1671, %v38_v9   ;;  %167 = vperm.xlu0 %1670, %v37_v10   ;;  %1686 = vrsqrt.f32 %v580_v1  ;;  %v642_v25 = vld [vmem:[%s3034_s6 + $0x20] sm:$0xff]  ;;  %v569_v26 = vld [vmem:[%s3032_s7 + $0x58] sm:$0xff]  ;;  %v627_v33 = vld [vmem:[%s3035_s5 + $0x28] sm:$0xff] }
  0x13   :  { %v549_v30 = vld [vmem:[%s3033_s4 + $0x38] sm:$0xff]  ;;  %v626_v34 = vld [vmem:[%s3035_s5 + $0x20] sm:$0xff] }
  0x14   :  { %v1673_v38 = vpop.eup %1672  ;;  %v550_v53 = vld [vmem:[%s3033_s4 + $0x40] sm:$0xff] }
  0x15   :  { %v1675_v41 = vpop.eup %1674  ;;  %v607_v48 = vmul.f32 %v1673_v38, %v543_v43  ;;  %v644_v43 = vld [vmem:[%s3034_s6 + $0x30] sm:$0xff] }
  0x16   :  { %182 = vperm.xlu1 %1671, %v40_v11   ;;  %177 = vperm.xlu0 %1670, %v39_v12   ;;  %v606_v49 = vmul.f32 %v1675_v41, %v542_v44  ;;  %v1677_v54 = vpop.eup %1676  ;;  %v547_v11 = vld [vmem:[%s3033_s4 + $0x28] sm:$0xff]  ;;  %v566_v12 = vld [vmem:[%s3032_s7 + $0x40] sm:$0xff] }
  0x17   :  { %v655_v55 = vmul.f32 %v639_v51, %v607_v48  ;;  %v1679_v59 = vpop.eup %1678  ;;  %v609_v0 = vmul.f32 %v1677_v54, %v545_v57  ;;  %v571_v44 = vld [vmem:[%s3032_s7 + $0x68] sm:$0xff]  ;;  %v629_v51 = vld [vmem:[%s3035_s5 + $0x38] sm:$0xff] }
  0x18   :  { %v654_v56 = vmul.f32 %v638_v52, %v606_v49  ;;  %v608_v4 = vmul.f32 %v1679_v59, %v544_v62  ;;  %v1681_v8 = vpop.eup %1680  ;;  %v628_v52 = vld [vmem:[%s3035_s5 + $0x30] sm:$0xff]  ;;  %v587_v54 = vadd.f32 0.001, %v571_v44  ;;  %v573_v62 = vld [vmem:[%s3032_s7 + $0x78] sm:$0xff] }
  0x19   :  { %v671_v2 = vsub.f32 %v623_v60, %v655_v55  ;;  %v657_v9 = vmul.f32 %v641_v5, %v609_v0  ;;  %v647_v60 = vld [vmem:[%s3034_s6 + $0x48] sm:$0xff] }
  0x1a   :  { %192 = vperm.xlu1 %1671, %v42_v13   ;;  %187 = vperm.xlu0 %1670, %v41_v14   ;;  %v670_v3 = vsub.f32 %v622_v61, %v654_v56  ;;  %v656_v10 = vmul.f32 %v640_v6, %v608_v4  ;;  %v1683_v13 = vpop.eup %1682  ;;  %v625_v14 = vld [vmem:[%s3035_s5 + $0x18] sm:$0xff]  ;;  %v646_v61 = vld [vmem:[%s3034_s6 + $0x40] sm:$0xff]  ;;  %v631_v5 = vld [vmem:[%s3035_s5 + $0x48] sm:$0xff] }
  0x1b   :  { %v673_v21 = vsub.f32 %v625_v14, %v657_v9  ;;  %v630_v6 = vld [vmem:[%s3035_s5 + $0x40] sm:$0xff]  ;;  %v649_v14 = vld [vmem:[%s3034_s6 + $0x58] sm:$0xff] }
  0x1e   :  { %202 = vperm.xlu1 %1671, %v44_v15   ;;  %197 = vperm.xlu0 %1670, %v43_v16   ;;  %v624_v15 = vld [vmem:[%s3035_s5 + $0x10] sm:$0xff]  ;;  %v546_v16 = vld [vmem:[%s3033_s4 + $0x20] sm:$0xff] }
  0x1f   :  { %v672_v22 = vsub.f32 %v624_v15, %v656_v10  ;;  %v648_v15 = vld [vmem:[%s3034_s6 + $0x50] sm:$0xff] }
  0x22   :  { %212 = vperm.xlu1 %1671, %v46_v17   ;;  %207 = vperm.xlu0 %1670, %v45_v18   ;;  %v583_v17 = vadd.f32 0.001, %v567_v7  ;;  %v350_v18 = vld [vmem:[%s3036_s2 + $0x8] sm:$0xff]  ;;  %v552_v7 = vld [vmem:[%s3033_s4 + $0x50] sm:$0xff] }
  0x23   :  { %445 = vmatprep.mubr.f32.mxu0 %v350_v18 }
  0x24   :  { %1688 = vrsqrt.f32 %v583_v17 }
  0x26   :  { %222 = vperm.xlu1 %1671, %v48_v19   ;;  %217 = vperm.xlu0 %1670, %v47_v20   ;;  %v611_v19 = vmul.f32 %v1681_v8, %v547_v11  ;;  %v582_v20 = vadd.f32 0.001, %v566_v12  ;;  %v589_v8 = vadd.f32 0.001, %v573_v62  ;;  %v65_v62 = vld [vmem:[%s3037_s0 + $0x20] sm:$0xff] }
  0x28   :  { %1690 = vrsqrt.f32 %v582_v20 }
  0x2a   :  { %232 = vperm.xlu1 %1671, %v50_v23   ;;  %227 = vperm.xlu0 %1670, %v49_v24   ;;  %v610_v23 = vmul.f32 %v1683_v13, %v546_v16  ;;  %v643_v24 = vld [vmem:[%s3034_s6 + $0x28] sm:$0xff] }
  0x2c   :  { %v658_v29 = vmul.f32 %v642_v25, %v610_v23 }
  0x2e   :  { %242 = vperm.xlu1 %1671, %v52_v27   ;;  %237 = vperm.xlu0 %1670, %v51_v28   ;;  %v1685_v27 = vpop.eup %1684  ;;  %v659_v28 = vmul.f32 %v643_v24, %v611_v19  ;;  %v674_v40 = vsub.f32 %v626_v34, %v658_v29  ;;  %v650_v29 = vld [vmem:[%s3034_s6 + $0x60] sm:$0xff] }
  0x2f   :  { %v613_v37 = vmul.f32 %v1685_v27, %v549_v30 }
  0x32   :  { %252 = vperm.xlu1 %1671, %v54_v31   ;;  %247 = vperm.xlu0 %1670, %v53_v32   ;;  %v568_v31 = vld [vmem:[%s3032_s7 + $0x50] sm:$0xff]  ;;  %v1687_v32 = vpop.eup %1686 }
  0x33   :  { %v584_v38 = vadd.f32 0.001, %v568_v31  ;;  %v1689_v45 = vpop.eup %1688 }
  0x36   :  { %262 = vperm.xlu1 %1671, %v56_v35   ;;  %257 = vperm.xlu0 %1670, %v55_v36   ;;  %v548_v35 = vld [vmem:[%s3033_s4 + $0x30] sm:$0xff]  ;;  %v585_v36 = vadd.f32 0.001, %v569_v26 }
  0x37   :  { %v612_v41 = vmul.f32 %v1687_v32, %v548_v35  ;;  %v635_v35 = vld [vmem:[%s3035_s5 + $0x68] sm:$0xff] }
  0x38   :  { %1692 = vrsqrt.f32 %v585_v36  ;;  %v634_v36 = vld [vmem:[%s3035_s5 + $0x60] sm:$0xff] }
  0x39   :  { %1694 = vrsqrt.f32 %v584_v38 }
  0x3a   :  { %272 = vperm.xlu1 %1671, %v58_v39   ;;  %267 = vperm.xlu0 %1670, %v57_v42   ;;  %v675_v39 = vsub.f32 %v627_v33, %v659_v28  ;;  %v645_v42 = vld [vmem:[%s3034_s6 + $0x38] sm:$0xff]  ;;  %1696 = vrsqrt.f32 %v587_v54  ;;  %v651_v28 = vld [vmem:[%s3034_s6 + $0x68] sm:$0xff] }
  0x3b   :  { %v661_v46 = vmul.f32 %v645_v42, %v613_v37  ;;  %v557_v33 = vld [vmem:[%s3033_s4 + $0x78] sm:$0xff]  ;;  %v62_v54 = vld [vmem:[%s3037_s0 + $0x8] sm:$0xff] }
  0x3c   :  { %v653_v42 = vld [vmem:[%s3034_s6 + $0x78] sm:$0xff] }
  0x3d   :  { %v677_v57 = vsub.f32 %v629_v51, %v661_v46  ;;  %v637_v46 = vld [vmem:[%s3035_s5 + $0x78] sm:$0xff] }
  0x3e   :  { %282 = vperm.xlu1 %1671, %v60_v47   ;;  %277 = vperm.xlu0 %1670, %v59_v50   ;;  %v660_v47 = vmul.f32 %v644_v43, %v612_v41  ;;  %v1691_v50 = vpop.eup %1690  ;;  %v652_v43 = vld [vmem:[%s3034_s6 + $0x70] sm:$0xff] }
  0x3f   :  { %v614_v59 = vmul.f32 %v1691_v50, %v550_v53  ;;  %v61_v53 = vld [vmem:[%s3037_s0] sm:$0xff] }
  0x40   :  { %v676_v58 = vsub.f32 %v628_v52, %v660_v47  ;;  %v636_v47 = vld [vmem:[%s3035_s5 + $0x70] sm:$0xff]  ;;  %v66_v52 = vld [vmem:[%s3037_s0 + $0x28] sm:$0xff] }
  0x41   :  { %v662_v1 = vmul.f32 %v646_v61, %v614_v59 }
  0x42   :  { %693 = vperm.xlu1 %1671, %v607_v48   ;;  %688 = vperm.xlu0 %1670, %v606_v49   ;;  %v551_v48 = vld [vmem:[%s3033_s4 + $0x48] sm:$0xff]  ;;  %v570_v49 = vld [vmem:[%s3032_s7 + $0x60] sm:$0xff]  ;;  %v1693_v63 = vpop.eup %1692 }
  0x43   :  { %v615_v55 = vmul.f32 %v1689_v45, %v551_v48  ;;  %v586_v56 = vadd.f32 0.001, %v570_v49  ;;  %v678_v12 = vsub.f32 %v630_v6, %v662_v1 }
  0x45   :  { %1698 = vrsqrt.f32 %v586_v56  ;;  %v63_v56 = vld [vmem:[%s3037_s0 + $0x10] sm:$0xff] }
  0x46   :  { %805 = vperm.xlu1 %1671, %v671_v2   ;;  %800 = vperm.xlu0 %1670, %v670_v3   ;;  %v553_v2 = vld [vmem:[%s3033_s4 + $0x58] sm:$0xff]  ;;  %v572_v3 = vld [vmem:[%s3032_s7 + $0x70] sm:$0xff]  ;;  %1700 = vrsqrt.f32 %v589_v8 }
  0x47   :  { %v617_v9 = vmul.f32 %v1693_v63, %v553_v2  ;;  %v588_v10 = vadd.f32 0.001, %v572_v3 }
  0x49   :  { %1702 = vrsqrt.f32 %v588_v10  ;;  %v665_v17 = vmul.f32 %v649_v14, %v617_v9 }
  0x4a   :  { %703 = vperm.xlu1 %1671, %v609_v0   ;;  %698 = vperm.xlu0 %1670, %v608_v4   ;;  %v663_v0 = vmul.f32 %v647_v60, %v615_v55  ;;  %v1695_v4 = vpop.eup %1694 }
  0x4b   :  { %v616_v13 = vmul.f32 %v1695_v4, %v552_v7  ;;  %v1697_v16 = vpop.eup %1696  ;;  %v72_v4 = vld [vmem:[%s3037_s0 + $0x58] sm:$0xff] }
  0x4c   :  { %v679_v11 = vsub.f32 %v631_v5, %v663_v0  ;;  %v67_v0 = vld [vmem:[%s3037_s0 + $0x30] sm:$0xff]  ;;  %v70_v5 = vld [vmem:[%s3037_s0 + $0x48] sm:$0xff] }
  0x4d   :  { %v664_v18 = vmul.f32 %v648_v15, %v616_v13  ;;  %v69_v15 = vld [vmem:[%s3037_s0 + $0x40] sm:$0xff] }
  0x4e   :  { %815 = vperm.xlu1 %1671, %v673_v21   ;;  %810 = vperm.xlu0 %1670, %v672_v22   ;;  %v633_v21 = vld [vmem:[%s3035_s5 + $0x58] sm:$0xff]  ;;  %v632_v22 = vld [vmem:[%s3035_s5 + $0x50] sm:$0xff] }
  0x4f   :  { %v1699_v20 = vpop.eup %1698  ;;  %v681_v25 = vsub.f32 %v633_v21, %v665_v17  ;;  %v680_v26 = vsub.f32 %v632_v22, %v664_v18  ;;  %v76_v17 = vld [vmem:[%s3037_s0 + $0x78] sm:$0xff]  ;;  %v74_v18 = vld [vmem:[%s3037_s0 + $0x68] sm:$0xff] }
  0x50   :  { %v1701_v30 = vpop.eup %1700 }
  0x51   :  { %v621_v38 = vmul.f32 %v1701_v30, %v557_v33  ;;  %v78_v30 = vld [vmem:[%s3037_s0 + $0x88] sm:$0xff] }
  0x52   :  { %713 = vperm.xlu1 %1671, %v611_v19   ;;  %708 = vperm.xlu0 %1670, %v610_v23   ;;  %v555_v19 = vld [vmem:[%s3033_s4 + $0x68] sm:$0xff]  ;;  %v554_v23 = vld [vmem:[%s3033_s4 + $0x60] sm:$0xff] }
  0x53   :  { %v619_v24 = vmul.f32 %v1697_v16, %v555_v19  ;;  %v618_v27 = vmul.f32 %v1699_v20, %v554_v23  ;;  %v1703_v34 = vpop.eup %1702  ;;  %v669_v44 = vmul.f32 %v653_v42, %v621_v38  ;;  %v82_v42 = vld [vmem:[%s3037_s0 + $0xa8] sm:$0xff] }
  0x55   :  { %v667_v31 = vmul.f32 %v651_v28, %v619_v24  ;;  %v666_v32 = vmul.f32 %v650_v29, %v618_v27  ;;  %v685_v48 = vsub.f32 %v637_v46, %v669_v44  ;;  %v80_v29 = vld [vmem:[%s3037_s0 + $0x98] sm:$0xff] }
  0x56   :  { %825 = vperm.xlu1 %1671, %v675_v39   ;;  %820 = vperm.xlu0 %1670, %v674_v40  }
  0x57   :  { %v683_v39 = vsub.f32 %v635_v35, %v667_v31  ;;  %v682_v40 = vsub.f32 %v634_v36, %v666_v32 }
  0x5a   :  { %723 = vperm.xlu1 %1671, %v613_v37   ;;  %718 = vperm.xlu0 %1670, %v612_v41   ;;  %v556_v37 = vld [vmem:[%s3033_s4 + $0x70] sm:$0xff] }
  0x5b   :  { %v620_v41 = vmul.f32 %v1703_v34, %v556_v37  ;;  %v79_v37 = vld [vmem:[%s3037_s0 + $0x90] sm:$0xff] }
  0x5d   :  { %v668_v45 = vmul.f32 %v652_v43, %v620_v41 }
  0x5e   :  { %835 = vperm.xlu1 %1671, %v677_v57   ;;  %830 = vperm.xlu0 %1670, %v676_v58   ;;  %v64_v57 = vld [vmem:[%s3037_s0 + $0x18] sm:$0xff] }
  0x5f   :  { %v684_v49 = vsub.f32 %v636_v47, %v668_v45 }
  0x62   :  { %733 = vperm.xlu1 %1671, %v615_v55   ;;  %728 = vperm.xlu0 %1670, %v614_v59   ;;  %v68_v55 = vld [vmem:[%s3037_s0 + $0x38] sm:$0xff] }
  0x66   :  { %845 = vperm.xlu1 %1671, %v679_v11   ;;  %840 = vperm.xlu0 %1670, %v678_v12  }
  0x6a   :  { %743 = vperm.xlu1 %1671, %v617_v9   ;;  %738 = vperm.xlu0 %1670, %v616_v13   ;;  %v71_v13 = vld [vmem:[%s3037_s0 + $0x50] sm:$0xff] }
  0x6e   :  { %855 = vperm.xlu1 %1671, %v681_v25   ;;  %850 = vperm.xlu0 %1670, %v680_v26   ;;  %v75_v25 = vld [vmem:[%s3037_s0 + $0x70] sm:$0xff] }
  0x72   :  { %753 = vperm.xlu1 %1671, %v619_v24   ;;  %748 = vperm.xlu0 %1670, %v618_v27   ;;  %v73_v27 = vld [vmem:[%s3037_s0 + $0x60] sm:$0xff] }
  0x76   :  { %865 = vperm.xlu1 %1671, %v683_v39   ;;  %860 = vperm.xlu0 %1670, %v682_v40   ;;  %v77_v39 = vld [vmem:[%s3037_s0 + $0x80] sm:$0xff] }
  0x7a   :  { %763 = vperm.xlu1 %1671, %v621_v38   ;;  %758 = vperm.xlu0 %1670, %v620_v41   ;;  %v84_v41 = vld [vmem:[%s3037_s0 + $0xb8] sm:$0xff] }
  0x7e   :  { %875 = vperm.xlu1 %1671, %v685_v48   ;;  %870 = vperm.xlu0 %1670, %v684_v49   ;;  %v83_v49 = vld [vmem:[%s3037_s0 + $0xb0] sm:$0xff] }
  0x81   :  { %v138_v50 = vpop.permute.xlu1 %137  ;;  %v128_v51 = vpop.permute.xlu0 %127 }
  0x82   :  { %v290_v58 = vmul.f32 %v138_v50, %v66_v52  ;;  %v285_v59 = vmul.f32 %v128_v51, %v61_v53  ;;  %v286_v63 = vmul.f32 %v128_v51, %v62_v54  ;;  %v289_v8 = vmul.f32 %v138_v50, %v65_v62  ;;  %v81_v51 = vld [vmem:[%s3037_s0 + $0xa0] sm:$0xff]  ;;  %v88_v53 = vld [vmem:[%s3037_s0 + $0xd8] sm:$0xff]  ;;  %v86_v54 = vld [vmem:[%s3037_s0 + $0xc8] sm:$0xff] }
  0x85   :  { %v143_v60 = vpop.permute.xlu1 %142  ;;  %v133_v61 = vpop.permute.xlu0 %132 }
  0x86   :  { %v292_v1 = vmul.f32 %v143_v60, %v68_v55  ;;  %v287_v2 = vmul.f32 %v133_v61, %v63_v56  ;;  %v288_v3 = vmul.f32 %v133_v61, %v64_v57  ;;  %v291_v9 = vmul.f32 %v143_v60, %v67_v0  ;;  %v87_v61 = vld [vmem:[%s3037_s0 + $0xd0] sm:$0xff] }
  0x88   :  { %v1556_v6 = vpack.c.bf16 %v288_v3, %v286_v63  ;;  %v1558_v7 = vpack.c.bf16 %v287_v2, %v285_v59  ;;  %v1560_v12 = vpack.c.bf16 %v292_v1, %v290_v58  ;;  %v1562_v19 = vpack.c.bf16 %v291_v9, %v289_v8  ;;  %v85_v63 = vld [vmem:[%s3037_s0 + $0xc0] sm:$0xff]  ;;  %v92_v1 = vld [vmem:[%s3037_s0 + $0xf8] sm:$0xff]  ;;  %v90_v2 = vld [vmem:[%s3037_s0 + $0xe8] sm:$0xff] }
  0x89   :  { %v153_v10 = vpop.permute.xlu1 %152  ;;  %v148_v11 = vpop.permute.xlu0 %147  ;;  %v91_v9 = vld [vmem:[%s3037_s0 + $0xf0] sm:$0xff] }
  0x8a   :  { %v296_v14 = vmul.f32 %v153_v10, %v72_v4  ;;  %v294_v16 = vmul.f32 %v148_v11, %v70_v5  ;;  %1557 = vmatprep.subr.bf16.mxu0 %v1556_v6  ;;  %v295_v20 = vmul.f32 %v153_v10, %v71_v13  ;;  %v293_v21 = vmul.f32 %v148_v11, %v69_v15  ;;  %v89_v11 = vld [vmem:[%s3037_s0 + $0xe0] sm:$0xff]  ;;  %v96_v13 = vld [vmem:[%s3037_s0 + $0x118] sm:$0xff] }
  0x8b   :  { %1559 = vmatpush1.bf16.msra.mxu0 %v1558_v7 }
  0x8c   :  { %1561 = vmatprep.subr.bf16.mxu0 %v1560_v12  ;;  %v1564_v24 = vpack.c.bf16 %v296_v14, %v294_v16  ;;  %v1566_v31 = vpack.c.bf16 %v295_v20, %v293_v21  ;;  %v94_v14 = vld [vmem:[%s3037_s0 + $0x108] sm:$0xff]  ;;  %v95_v21 = vld [vmem:[%s3037_s0 + $0x110] sm:$0xff] }
  0x8d   :  { %v163_v22 = vpop.permute.xlu1 %162  ;;  %v158_v23 = vpop.permute.xlu0 %157 }
  0x8e   :  { %v300_v26 = vmul.f32 %v163_v22, %v76_v17  ;;  %v298_v28 = vmul.f32 %v158_v23, %v74_v18  ;;  %v299_v32 = vmul.f32 %v163_v22, %v75_v25  ;;  %v297_v33 = vmul.f32 %v158_v23, %v73_v27  ;;  %v93_v23 = vld [vmem:[%s3037_s0 + $0x100] sm:$0xff]  ;;  %v100_v25 = vld [vmem:[%s3037_s0 + $0x138] sm:$0xff] }
  0x8f   :  { %1563 = vmatpush1.bf16.msra.mxu0 %v1562_v19 }
  0x90   :  { %1565 = vmatprep.subr.bf16.mxu0 %v1564_v24  ;;  %v1568_v36 = vpack.c.bf16 %v300_v26, %v298_v28  ;;  %v1570_v43 = vpack.c.bf16 %v299_v32, %v297_v33  ;;  %v98_v26 = vld [vmem:[%s3037_s0 + $0x128] sm:$0xff]  ;;  %v99_v33 = vld [vmem:[%s3037_s0 + $0x130] sm:$0xff] }
  0x91   :  { %v173_v34 = vpop.permute.xlu1 %172  ;;  %v168_v35 = vpop.permute.xlu0 %167 }
  0x92   :  { %v304_v38 = vmul.f32 %v173_v34, %v80_v29  ;;  %v302_v40 = vmul.f32 %v168_v35, %v78_v30  ;;  %v303_v44 = vmul.f32 %v173_v34, %v79_v37  ;;  %v301_v45 = vmul.f32 %v168_v35, %v77_v39  ;;  %v97_v35 = vld [vmem:[%s3037_s0 + $0x120] sm:$0xff]  ;;  %v104_v37 = vld [vmem:[%s3037_s0 + $0x158] sm:$0xff] }
  0x93   :  { %1567 = vmatpush1.bf16.msra.mxu0 %v1566_v31 }
  0x94   :  { %1569 = vmatprep.subr.bf16.mxu0 %v1568_v36  ;;  %v1572_v48 = vpack.c.bf16 %v304_v38, %v302_v40  ;;  %v1574_v55 = vpack.c.bf16 %v303_v44, %v301_v45  ;;  %v102_v38 = vld [vmem:[%s3037_s0 + $0x148] sm:$0xff]  ;;  %v103_v45 = vld [vmem:[%s3037_s0 + $0x150] sm:$0xff] }
  0x95   :  { %v183_v46 = vpop.permute.xlu1 %182  ;;  %v178_v47 = vpop.permute.xlu0 %177 }
  0x96   :  { %v308_v50 = vmul.f32 %v183_v46, %v84_v41  ;;  %v306_v52 = vmul.f32 %v178_v47, %v82_v42  ;;  %v307_v56 = vmul.f32 %v183_v46, %v83_v49  ;;  %v305_v57 = vmul.f32 %v178_v47, %v81_v51  ;;  %v101_v47 = vld [vmem:[%s3037_s0 + $0x140] sm:$0xff]  ;;  %v108_v49 = vld [vmem:[%s3037_s0 + $0x178] sm:$0xff] }
  0x97   :  { %1571 = vmatpush1.bf16.msra.mxu0 %v1570_v43 }
  0x98   :  { %1573 = vmatprep.subr.bf16.mxu0 %v1572_v48  ;;  %v1576_v60 = vpack.c.bf16 %v308_v50, %v306_v52  ;;  %v1578_v3 = vpack.c.bf16 %v307_v56, %v305_v57  ;;  %v106_v50 = vld [vmem:[%s3037_s0 + $0x168] sm:$0xff]  ;;  %v107_v57 = vld [vmem:[%s3037_s0 + $0x170] sm:$0xff] }
  0x99   :  { %v193_v58 = vpop.permute.xlu1 %192  ;;  %v188_v59 = vpop.permute.xlu0 %187 }
  0x9a   :  { %v312_v62 = vmul.f32 %v193_v58, %v88_v53  ;;  %v310_v0 = vmul.f32 %v188_v59, %v86_v54  ;;  %v311_v4 = vmul.f32 %v193_v58, %v87_v61  ;;  %v309_v5 = vmul.f32 %v188_v59, %v85_v63  ;;  %v105_v59 = vld [vmem:[%s3037_s0 + $0x160] sm:$0xff]  ;;  %v112_v61 = vld [vmem:[%s3037_s0 + $0x198] sm:$0xff] }
  0x9b   :  { %1575 = vmatpush1.bf16.msra.mxu0 %v1574_v55 }
  0x9c   :  { %1577 = vmatprep.subr.bf16.mxu0 %v1576_v60  ;;  %v1580_v8 = vpack.c.bf16 %v312_v62, %v310_v0  ;;  %v1582_v15 = vpack.c.bf16 %v311_v4, %v309_v5  ;;  %v110_v62 = vld [vmem:[%s3037_s0 + $0x188] sm:$0xff]  ;;  %v111_v5 = vld [vmem:[%s3037_s0 + $0x190] sm:$0xff] }
  0x9d   :  { %v203_v6 = vpop.permute.xlu1 %202  ;;  %v198_v7 = vpop.permute.xlu0 %197 }
  0x9e   :  { %v316_v10 = vmul.f32 %v203_v6, %v92_v1  ;;  %v314_v12 = vmul.f32 %v198_v7, %v90_v2  ;;  %v315_v16 = vmul.f32 %v203_v6, %v91_v9  ;;  %v313_v17 = vmul.f32 %v198_v7, %v89_v11  ;;  %v109_v7 = vld [vmem:[%s3037_s0 + $0x180] sm:$0xff]  ;;  %v116_v9 = vld [vmem:[%s3037_s0 + $0x1b8] sm:$0xff] }
  0x9f   :  { %1579 = vmatpush1.bf16.msra.mxu0 %v1578_v3 }
  0xa0   :  { %1581 = vmatprep.subr.bf16.mxu0 %v1580_v8  ;;  %v1584_v20 = vpack.c.bf16 %v316_v10, %v314_v12  ;;  %v1586_v27 = vpack.c.bf16 %v315_v16, %v313_v17  ;;  %v114_v10 = vld [vmem:[%s3037_s0 + $0x1a8] sm:$0xff]  ;;  %v115_v17 = vld [vmem:[%s3037_s0 + $0x1b0] sm:$0xff] }
  0xa1   :  { %v213_v18 = vpop.permute.xlu1 %212  ;;  %v208_v19 = vpop.permute.xlu0 %207 }
  0xa2   :  { %v320_v22 = vmul.f32 %v213_v18, %v96_v13  ;;  %v318_v24 = vmul.f32 %v208_v19, %v94_v14  ;;  %v319_v28 = vmul.f32 %v213_v18, %v95_v21  ;;  %v317_v29 = vmul.f32 %v208_v19, %v93_v23  ;;  %v113_v19 = vld [vmem:[%s3037_s0 + $0x1a0] sm:$0xff]  ;;  %v120_v21 = vld [vmem:[%s3037_s0 + $0x1d8] sm:$0xff] }
  0xa3   :  { %1583 = vmatpush1.bf16.msra.mxu0 %v1582_v15 }
  0xa4   :  { %1585 = vmatprep.subr.bf16.mxu0 %v1584_v20  ;;  %v1588_v32 = vpack.c.bf16 %v320_v22, %v318_v24  ;;  %v1590_v39 = vpack.c.bf16 %v319_v28, %v317_v29  ;;  %v118_v22 = vld [vmem:[%s3037_s0 + $0x1c8] sm:$0xff]  ;;  %v119_v29 = vld [vmem:[%s3037_s0 + $0x1d0] sm:$0xff] }
  0xa5   :  { %v223_v30 = vpop.permute.xlu1 %222  ;;  %v218_v31 = vpop.permute.xlu0 %217 }
  0xa6   :  { %v324_v34 = vmul.f32 %v223_v30, %v100_v25  ;;  %v322_v36 = vmul.f32 %v218_v31, %v98_v26  ;;  %v323_v40 = vmul.f32 %v223_v30, %v99_v33  ;;  %v321_v41 = vmul.f32 %v218_v31, %v97_v35  ;;  %v117_v31 = vld [vmem:[%s3037_s0 + $0x1c0] sm:$0xff]  ;;  %v124_v33 = vld [vmem:[%s3037_s0 + $0x1f8] sm:$0xff] }
  0xa7   :  { %1587 = vmatpush1.bf16.msra.mxu0 %v1586_v27 }
  0xa8   :  { %1589 = vmatprep.subr.bf16.mxu0 %v1588_v32  ;;  %v1592_v44 = vpack.c.bf16 %v324_v34, %v322_v36  ;;  %v1594_v51 = vpack.c.bf16 %v323_v40, %v321_v41  ;;  %v122_v34 = vld [vmem:[%s3037_s0 + $0x1e8] sm:$0xff]  ;;  %v123_v41 = vld [vmem:[%s3037_s0 + $0x1f0] sm:$0xff] }
  0xa9   :  { %v233_v42 = vpop.permute.xlu1 %232  ;;  %v228_v43 = vpop.permute.xlu0 %227 }
  0xaa   :  { %v328_v46 = vmul.f32 %v233_v42, %v104_v37  ;;  %v326_v48 = vmul.f32 %v228_v43, %v102_v38  ;;  %v327_v52 = vmul.f32 %v233_v42, %v103_v45  ;;  %v325_v53 = vmul.f32 %v228_v43, %v101_v47  ;;  %v121_v43 = vld [vmem:[%s3037_s0 + $0x1e0] sm:$0xff] }
  0xab   :  { %1591 = vmatpush1.bf16.msra.mxu0 %v1590_v39 }
  0xac   :  { %1593 = vmatprep.subr.bf16.mxu0 %v1592_v44  ;;  %v1596_v56 = vpack.c.bf16 %v328_v46, %v326_v48  ;;  %v1598_v63 = vpack.c.bf16 %v327_v52, %v325_v53  ;;  %v351_v52 = vld [vmem:[%s3036_s2 + $0x10] sm:$0xff]  ;;  %v354_v53 = vld [vmem:[%s3036_s2 + $0x28] sm:$0xff] }
  0xad   :  { %v243_v54 = vpop.permute.xlu1 %242  ;;  %v238_v55 = vpop.permute.xlu0 %237 }
  0xae   :  { %v332_v58 = vmul.f32 %v243_v54, %v108_v49  ;;  %v330_v60 = vmul.f32 %v238_v55, %v106_v50  ;;  %v331_v0 = vmul.f32 %v243_v54, %v107_v57  ;;  %v329_v1 = vmul.f32 %v238_v55, %v105_v59  ;;  %v349_v50 = vld [vmem:[%s3036_s2] sm:$0xff]  ;;  %v356_v55 = vld [vmem:[%s3036_s2 + $0x38] sm:$0xff]  ;;  %v358_v57 = vld [vmem:[%s3036_s2 + $0x48] sm:$0xff] }
  0xaf   :  { %1595 = vmatpush1.bf16.msra.mxu0 %v1594_v51  ;;  %v352_v51 = vld [vmem:[%s3036_s2 + $0x18] sm:$0xff]  ;;  %v353_v54 = vld [vmem:[%s3036_s2 + $0x20] sm:$0xff] }
  0xb0   :  { %1597 = vmatprep.subr.bf16.mxu0 %v1596_v56  ;;  %v1600_v4 = vpack.c.bf16 %v332_v58, %v330_v60  ;;  %v1602_v11 = vpack.c.bf16 %v331_v0, %v329_v1  ;;  %v355_v56 = vld [vmem:[%s3036_s2 + $0x30] sm:$0xff]  ;;  %v357_v58 = vld [vmem:[%s3036_s2 + $0x40] sm:$0xff]  ;;  %v360_v59 = vld [vmem:[%s3036_s2 + $0x58] sm:$0xff] }
  0xb1   :  { %v253_v2 = vpop.permute.xlu1 %252  ;;  %v248_v3 = vpop.permute.xlu0 %247  ;;  %v359_v60 = vld [vmem:[%s3036_s2 + $0x50] sm:$0xff]  ;;  %v366_v1 = vld [vmem:[%s3036_s2 + $0x88] sm:$0xff] }
  0xb2   :  { %v336_v6 = vmul.f32 %v253_v2, %v112_v61  ;;  %v334_v8 = vmul.f32 %v248_v3, %v110_v62  ;;  %v335_v12 = vmul.f32 %v253_v2, %v111_v5  ;;  %v333_v13 = vmul.f32 %v248_v3, %v109_v7  ;;  %v362_v61 = vld [vmem:[%s3036_s2 + $0x68] sm:$0xff]  ;;  %v361_v62 = vld [vmem:[%s3036_s2 + $0x60] sm:$0xff]  ;;  %v363_v0 = vld [vmem:[%s3036_s2 + $0x70] sm:$0xff] }
  0xb3   :  { %1599 = vmatpush1.bf16.msra.mxu0 %v1598_v63  ;;  %v364_v63 = vld [vmem:[%s3036_s2 + $0x78] sm:$0xff]  ;;  %v365_v2 = vld [vmem:[%s3036_s2 + $0x80] sm:$0xff]  ;;  %v370_v5 = vld [vmem:[%s3036_s2 + $0xa8] sm:$0xff] }
  0xb4   :  { %1601 = vmatprep.subr.bf16.mxu0 %v1600_v4  ;;  %v1604_v16 = vpack.c.bf16 %v336_v6, %v334_v8  ;;  %v1606_v23 = vpack.c.bf16 %v335_v12, %v333_v13  ;;  %v368_v3 = vld [vmem:[%s3036_s2 + $0x98] sm:$0xff]  ;;  %v367_v4 = vld [vmem:[%s3036_s2 + $0x90] sm:$0xff]  ;;  %v369_v6 = vld [vmem:[%s3036_s2 + $0xa0] sm:$0xff] }
  0xb5   :  { %v263_v14 = vpop.permute.xlu1 %262  ;;  %v258_v15 = vpop.permute.xlu0 %257  ;;  %v372_v7 = vld [vmem:[%s3036_s2 + $0xb8] sm:$0xff]  ;;  %v371_v8 = vld [vmem:[%s3036_s2 + $0xb0] sm:$0xff]  ;;  %v378_v13 = vld [vmem:[%s3036_s2 + $0xe8] sm:$0xff] }
  0xb6   :  { %v340_v18 = vmul.f32 %v263_v14, %v116_v9  ;;  %v338_v20 = vmul.f32 %v258_v15, %v114_v10  ;;  %v339_v24 = vmul.f32 %v263_v14, %v115_v17  ;;  %v337_v25 = vmul.f32 %v258_v15, %v113_v19  ;;  %v374_v9 = vld [vmem:[%s3036_s2 + $0xc8] sm:$0xff]  ;;  %v373_v10 = vld [vmem:[%s3036_s2 + $0xc0] sm:$0xff]  ;;  %v375_v12 = vld [vmem:[%s3036_s2 + $0xd0] sm:$0xff] }
  0xb7   :  { %1603 = vmatpush1.bf16.msra.mxu0 %v1602_v11  ;;  %v376_v11 = vld [vmem:[%s3036_s2 + $0xd8] sm:$0xff]  ;;  %v377_v14 = vld [vmem:[%s3036_s2 + $0xe0] sm:$0xff]  ;;  %v1705_v17 = vmov 0.0  }
  0xb8   :  { %1605 = vmatprep.subr.bf16.mxu0 %v1604_v16  ;;  %v1608_v28 = vpack.c.bf16 %v340_v18, %v338_v20  ;;  %v1610_v35 = vpack.c.bf16 %v339_v24, %v337_v25  ;;  %v380_v15 = vld [vmem:[%s3036_s2 + $0xf8] sm:$0xff]  ;;  %v379_v16 = vld [vmem:[%s3036_s2 + $0xf0] sm:$0xff]  ;;  %1158 = vmatprep.mubr.f32.mxu1 %v1705_v17 }
  0xb9   :  { %v273_v26 = vpop.permute.xlu1 %272  ;;  %v268_v27 = vpop.permute.xlu0 %267 }
  0xba   :  { %v344_v30 = vmul.f32 %v273_v26, %v120_v21  ;;  %v342_v32 = vmul.f32 %v268_v27, %v118_v22  ;;  %v343_v36 = vmul.f32 %v273_v26, %v119_v29  ;;  %v341_v37 = vmul.f32 %v268_v27, %v117_v31 }
  0xbb   :  { %1607 = vmatpush1.bf16.msra.mxu0 %v1606_v23 }
  0xbc   :  { %1609 = vmatprep.subr.bf16.mxu0 %v1608_v28  ;;  %v1612_v40 = vpack.c.bf16 %v344_v30, %v342_v32  ;;  %v1614_v45 = vpack.c.bf16 %v343_v36, %v341_v37 }
  0xbd   :  { %v283_v38 = vpop.permute.xlu1 %282  ;;  %v278_v39 = vpop.permute.xlu0 %277 }
  0xbe   :  { %v348_v42 = vmul.f32 %v283_v38, %v124_v33  ;;  %v346_v44 = vmul.f32 %v278_v39, %v122_v34  ;;  %v347_v46 = vmul.f32 %v283_v38, %v123_v41  ;;  %v345_v47 = vmul.f32 %v278_v39, %v121_v43 }
  0xbf   :  { %1611 = vmatpush1.bf16.msra.mxu0 %v1610_v35 }
  0xc0   :  { %1613 = vmatprep.subr.bf16.mxu0 %v1612_v40  ;;  %v1616_v48 = vpack.c.bf16 %v348_v42, %v346_v44  ;;  %v1618_v49 = vpack.c.bf16 %v347_v46, %v345_v47 }
  0xc1   :  { %v694_v18 = vpop.permute.xlu1 %693  ;;  %v689_v19 = vpop.permute.xlu0 %688 }
  0xc3   :  { %1615 = vmatpush1.bf16.msra.mxu0 %v1614_v45 }
  0xc4   :  { %1617 = vmatprep.subr.bf16.mxu0 %v1616_v48 }
  0xc5   :  { %v806_v20 = vpop.permute.xlu1 %805  ;;  %v801_v21 = vpop.permute.xlu0 %800 }
  0xc7   :  { %1619 = vmatpush1.bf16.msra.mxu0 %v1618_v49 }
  0xc9   :  { %v704_v22 = vpop.permute.xlu1 %703  ;;  %v699_v23 = vpop.permute.xlu0 %698 }
  0xca   :  { %446 = vmatmul.mubr.f32.vlgmr.msra.gmra.mrb[0].mxu0 %v349_v50 }
  0xcb   :  { %451 = vmatprep.mubr.f32.mxu0 %v352_v51 }
  0xcd   :  { %v816_v24 = vpop.permute.xlu1 %815  ;;  %v811_v25 = vpop.permute.xlu0 %810 }
  0xce   :  { %452 = vmatmul.mubr.f32.gmra.mrb[2].mxu0 %v351_v52 }
  0xcf   :  { %457 = vmatprep.mubr.f32.mxu0 %v354_v53 }
  0xd1   :  { %v714_v26 = vpop.permute.xlu1 %713  ;;  %v709_v27 = vpop.permute.xlu0 %708 }
  0xd2   :  { %458 = vmatmul.mubr.f32.gmra.mrb[4].mxu0 %v353_v54 }
  0xd3   :  { %463 = vmatprep.mubr.f32.mxu0 %v356_v55 }
  0xd5   :  { %v826_v29 = vpop.permute.xlu1 %825  ;;  %v821_v31 = vpop.permute.xlu0 %820 }
  0xd6   :  { %464 = vmatmul.mubr.f32.gmra.mrb[6].mxu0 %v355_v56 }
  0xd7   :  { %469 = vmatprep.mubr.f32.mxu0 %v358_v57 }
  0xd9   :  { %v724_v38 = vpop.permute.xlu1 %723  ;;  %v719_v41 = vpop.permute.xlu0 %718 }
  0xda   :  { %470 = vmatmul.mubr.f32.gmra.mrb[8].mxu0 %v357_v58 }
  0xdb   :  { %475 = vmatprep.mubr.f32.mxu0 %v360_v59 }
  0xdd   :  { %v836_v51 = vpop.permute.xlu1 %835  ;;  %v831_v54 = vpop.permute.xlu0 %830 }
  0xde   :  { %476 = vmatmul.mubr.f32.gmra.mrb[10].mxu0 %v359_v60 }
  0xdf   :  { %481 = vmatprep.mubr.f32.mxu0 %v362_v61 }
  0xe2   :  { %482 = vmatmul.mubr.f32.gmra.mrb[12].mxu0 %v361_v62 }
  0xe3   :  { %487 = vmatprep.mubr.f32.mxu0 %v364_v63 }
  0xe6   :  { %488 = vmatmul.mubr.f32.gmra.mrb[14].mxu0 %v363_v0  ;;  %v734_v0 = vpop.permute.xlu1 %733 }
  0xe7   :  { %493 = vmatprep.mubr.f32.mxu0 %v366_v1 }
  0xea   :  { %494 = vmatmul.mubr.f32.gmra.mrb[16].mxu0 %v365_v2  ;;  %v729_v2 = vpop.permute.xlu0 %728 }
  0xeb   :  { %499 = vmatprep.mubr.f32.mxu0 %v368_v3 }
  0xee   :  { %500 = vmatmul.mubr.f32.gmra.mrb[18].mxu0 %v367_v4 }
  0xef   :  { %505 = vmatprep.mubr.f32.mxu0 %v370_v5 }
  0xf2   :  { %506 = vmatmul.mubr.f32.gmra.mrb[20].mxu0 %v369_v6 }
  0xf3   :  { %511 = vmatprep.mubr.f32.mxu0 %v372_v7 }
  0xf6   :  { %512 = vmatmul.mubr.f32.gmra.mrb[22].mxu0 %v371_v8 }
  0xf7   :  { %517 = vmatprep.mubr.f32.mxu0 %v374_v9 }
  0xfa   :  { %518 = vmatmul.mubr.f32.gmra.mrb[24].mxu0 %v373_v10 }
  0xfb   :  { %523 = vmatprep.mubr.f32.mxu0 %v376_v11 }
  0xfe   :  { %524 = vmatmul.mubr.f32.gmra.mrb[26].mxu0 %v375_v12 }
  0xff   :  { %529 = vmatprep.mubr.f32.mxu0 %v378_v13  ;;  %v846_v13 = vpop.permute.xlu1 %845 }
 0x102   :  { %530 = vmatmul.mubr.f32.gmra.mrb[28].mxu0 %v377_v14 }
 0x103   :  { %535 = vmatprep.mubr.f32.mxu0 %v380_v15 }
 0x106   :  { %536 = vmatmul.mubr.f32.gmra.mrb[30].mxu0 %v379_v16  ;;  %v841_v16 = vpop.permute.xlu0 %840 }
 0x107   :  { %1038 = vmatprep.mubr.f32.mxu0 %v1705_v17 }
 0x19d   :  { %v447_v28 = vpop.f32.mrb[0].mxu0 }
 0x19e   :  { %v449_v30 = vpop.f32.mrb[1].mxu0  ;;  %v766_v32 = vmul.f32 %v689_v19, %v447_v28  ;;  %v739_v28 = vpop.permute.xlu0 %738 }
 0x19f   :  { %v767_v33 = vmul.f32 %v689_v19, %v449_v30 }
 0x1a0   :  { %v878_v39 = vadd.f32 %v801_v21, %v766_v32 }
 0x1a1   :  { %v453_v34 = vpop.f32.mrb[2].mxu0  ;;  %v879_v42 = vadd.f32 %v801_v21, %v767_v33 }
 0x1a2   :  { %v768_v35 = vmul.f32 %v694_v18, %v453_v34  ;;  %v455_v36 = vpop.f32.mrb[3].mxu0 }
 0x1a3   :  { %v769_v37 = vmul.f32 %v694_v18, %v455_v36 }
 0x1a4   :  { %v880_v40 = vadd.f32 %v806_v20, %v768_v35 }
 0x1a5   :  { %v881_v43 = vadd.f32 %v806_v20, %v769_v37  ;;  %v459_v44 = vpop.f32.mrb[4].mxu0 }
 0x1a6   :  { %v1622_v45 = vpack.c.bf16 %v880_v40, %v878_v39  ;;  %v461_v46 = vpop.f32.mrb[5].mxu0  ;;  %v770_v48 = vmul.f32 %v699_v23, %v459_v44 }
 0x1a7   :  { %v1620_v47 = vpack.c.bf16 %v881_v43, %v879_v42  ;;  %v771_v49 = vmul.f32 %v699_v23, %v461_v46 }
 0x1a8   :  { %v882_v56 = vadd.f32 %v811_v25, %v770_v48 }
 0x1a9   :  { %v465_v50 = vpop.f32.mrb[6].mxu0  ;;  %1621 = vmatprep.subr.bf16.mxu0 %v1620_v47  ;;  %1652 = vmatprep.subr.bf16.mxu1 %v1620_v47  ;;  %v883_v58 = vadd.f32 %v811_v25, %v771_v49  ;;  %v744_v25 = vpop.permute.xlu1 %743 }
 0x1aa   :  { %v772_v52 = vmul.f32 %v704_v22, %v465_v50  ;;  %v467_v53 = vpop.f32.mrb[7].mxu0  ;;  %1623 = vmatpush1.bf16.msra.mxu0 %v1622_v45  ;;  %1660 = vmatpush1.bf16.msra.mxu1 %v1622_v45 }
 0x1ab   :  { %v773_v55 = vmul.f32 %v704_v22, %v467_v53 }
 0x1ac   :  { %v884_v57 = vadd.f32 %v816_v24, %v772_v52 }
 0x1ad   :  { %v885_v59 = vadd.f32 %v816_v24, %v773_v55  ;;  %v471_v60 = vpop.f32.mrb[8].mxu0  ;;  %v856_v39 = vpop.permute.xlu1 %855 }
 0x1ae   :  { %v1626_v61 = vpack.c.bf16 %v884_v57, %v882_v56  ;;  %v473_v62 = vpop.f32.mrb[9].mxu0  ;;  %v774_v1 = vmul.f32 %v709_v27, %v471_v60 }
 0x1af   :  { %v1624_v63 = vpack.c.bf16 %v885_v59, %v883_v58  ;;  %v775_v3 = vmul.f32 %v709_v27, %v473_v62 }
 0x1b0   :  { %v886_v8 = vadd.f32 %v821_v31, %v774_v1 }
 0x1b1   :  { %v477_v4 = vpop.f32.mrb[10].mxu0  ;;  %1625 = vmatprep.subr.bf16.mxu0 %v1624_v63  ;;  %1653 = vmatprep.subr.bf16.mxu1 %v1624_v63  ;;  %v887_v10 = vadd.f32 %v821_v31, %v775_v3 }
 0x1b2   :  { %v776_v5 = vmul.f32 %v714_v26, %v477_v4  ;;  %v479_v6 = vpop.f32.mrb[11].mxu0  ;;  %1627 = vmatpush1.bf16.msra.mxu0 %v1626_v61  ;;  %1661 = vmatpush1.bf16.msra.mxu1 %v1626_v61 }
 0x1b3   :  { %v777_v7 = vmul.f32 %v714_v26, %v479_v6 }
 0x1b4   :  { %v888_v9 = vadd.f32 %v826_v29, %v776_v5 }
 0x1b5   :  { %v889_v11 = vadd.f32 %v826_v29, %v777_v7  ;;  %v483_v12 = vpop.f32.mrb[12].mxu0 }
 0x1b6   :  { %v1630_v14 = vpack.c.bf16 %v888_v9, %v886_v8  ;;  %v485_v15 = vpop.f32.mrb[13].mxu0  ;;  %v778_v19 = vmul.f32 %v719_v41, %v483_v12 }
 0x1b7   :  { %v1628_v18 = vpack.c.bf16 %v889_v11, %v887_v10  ;;  %v779_v20 = vmul.f32 %v719_v41, %v485_v15 }
 0x1b8   :  { %v890_v26 = vadd.f32 %v831_v54, %v778_v19 }
 0x1b9   :  { %v489_v21 = vpop.f32.mrb[14].mxu0  ;;  %1629 = vmatprep.subr.bf16.mxu0 %v1628_v18  ;;  %1654 = vmatprep.subr.bf16.mxu1 %v1628_v18  ;;  %v891_v29 = vadd.f32 %v831_v54, %v779_v20 }
 0x1ba   :  { %v780_v22 = vmul.f32 %v724_v38, %v489_v21  ;;  %v491_v23 = vpop.f32.mrb[15].mxu0  ;;  %1631 = vmatpush1.bf16.msra.mxu0 %v1630_v14  ;;  %1662 = vmatpush1.bf16.msra.mxu1 %v1630_v14 }
 0x1bb   :  { %v781_v24 = vmul.f32 %v724_v38, %v491_v23  ;;  %v851_v38 = vpop.permute.xlu0 %850 }
 0x1bc   :  { %v892_v27 = vadd.f32 %v836_v51, %v780_v22 }
 0x1bd   :  { %v893_v30 = vadd.f32 %v836_v51, %v781_v24  ;;  %v495_v31 = vpop.f32.mrb[16].mxu0  ;;  %v754_v51 = vpop.permute.xlu1 %753 }
 0x1be   :  { %v1634_v32 = vpack.c.bf16 %v892_v27, %v890_v26  ;;  %v497_v33 = vpop.f32.mrb[17].mxu0  ;;  %v782_v35 = vmul.f32 %v729_v2, %v495_v31 }
 0x1bf   :  { %v1632_v34 = vpack.c.bf16 %v893_v30, %v891_v29  ;;  %v783_v36 = vmul.f32 %v729_v2, %v497_v33  ;;  %v749_v53 = vpop.permute.xlu0 %748 }
 0x1c0   :  { %v894_v43 = vadd.f32 %v841_v16, %v782_v35 }
 0x1c1   :  { %v501_v37 = vpop.f32.mrb[18].mxu0  ;;  %1633 = vmatprep.subr.bf16.mxu0 %v1632_v34  ;;  %1655 = vmatprep.subr.bf16.mxu1 %v1632_v34  ;;  %v895_v45 = vadd.f32 %v841_v16, %v783_v36  ;;  %v930_v36 = vld [vmem:[%s3038_s3 + $0xa0] sm:$0xff] }
 0x1c2   :  { %v784_v40 = vmul.f32 %v734_v0, %v501_v37  ;;  %v503_v41 = vpop.f32.mrb[19].mxu0  ;;  %1635 = vmatpush1.bf16.msra.mxu0 %v1634_v32  ;;  %1663 = vmatpush1.bf16.msra.mxu1 %v1634_v32  ;;  %v910_v37 = vld [vmem:[%s3038_s3] sm:$0xff] }
 0x1c3   :  { %v785_v42 = vmul.f32 %v734_v0, %v503_v41  ;;  %v866_v0 = vpop.permute.xlu1 %865  ;;  %v861_v3 = vpop.permute.xlu0 %860  ;;  %v932_v41 = vld [vmem:[%s3038_s3 + $0xb0] sm:$0xff] }
 0x1c4   :  { %v896_v44 = vadd.f32 %v846_v13, %v784_v40  ;;  %v911_v40 = vld [vmem:[%s3038_s3 + $0x8] sm:$0xff] }
 0x1c5   :  { %v897_v46 = vadd.f32 %v846_v13, %v785_v42  ;;  %v507_v47 = vpop.f32.mrb[20].mxu0  ;;  %v933_v42 = vld [vmem:[%s3038_s3 + $0xb8] sm:$0xff] }
 0x1c6   :  { %v1638_v48 = vpack.c.bf16 %v896_v44, %v894_v43  ;;  %v509_v49 = vpop.f32.mrb[21].mxu0  ;;  %v786_v52 = vmul.f32 %v739_v28, %v507_v47  ;;  %v913_v43 = vld [vmem:[%s3038_s3 + $0x18] sm:$0xff]  ;;  %v934_v44 = vld [vmem:[%s3038_s3 + $0xc0] sm:$0xff]  ;;  %v915_v47 = vld [vmem:[%s3038_s3 + $0x28] sm:$0xff] }
 0x1c7   :  { %v1636_v50 = vpack.c.bf16 %v897_v46, %v895_v45  ;;  %v787_v54 = vmul.f32 %v739_v28, %v509_v49  ;;  %v764_v11 = vpop.permute.xlu1 %763  ;;  %v759_v14 = vpop.permute.xlu0 %758  ;;  %v914_v45 = vld [vmem:[%s3038_s3 + $0x20] sm:$0xff]  ;;  %v935_v46 = vld [vmem:[%s3038_s3 + $0xc8] sm:$0xff]  ;;  %v916_v49 = vld [vmem:[%s3038_s3 + $0x30] sm:$0xff] }
 0x1c8   :  { %v898_v59 = vadd.f32 %v851_v38, %v786_v52  ;;  %v938_v52 = vld [vmem:[%s3038_s3 + $0xe0] sm:$0xff] }
 0x1c9   :  { %v513_v55 = vpop.f32.mrb[22].mxu0  ;;  %1637 = vmatprep.subr.bf16.mxu0 %v1636_v50  ;;  %1656 = vmatprep.subr.bf16.mxu1 %v1636_v50  ;;  %v899_v61 = vadd.f32 %v851_v38, %v787_v54  ;;  %v912_v38 = vld [vmem:[%s3038_s3 + $0x10] sm:$0xff]  ;;  %v937_v50 = vld [vmem:[%s3038_s3 + $0xd8] sm:$0xff]  ;;  %v939_v54 = vld [vmem:[%s3038_s3 + $0xe8] sm:$0xff] }
 0x1ca   :  { %v788_v56 = vmul.f32 %v744_v25, %v513_v55  ;;  %v515_v57 = vpop.f32.mrb[23].mxu0  ;;  %1639 = vmatpush1.bf16.msra.mxu0 %v1638_v48  ;;  %1664 = vmatpush1.bf16.msra.mxu1 %v1638_v48  ;;  %v936_v48 = vld [vmem:[%s3038_s3 + $0xd0] sm:$0xff]  ;;  %v919_v55 = vld [vmem:[%s3038_s3 + $0x48] sm:$0xff] }
 0x1cb   :  { %v789_v58 = vmul.f32 %v744_v25, %v515_v57  ;;  %v876_v27 = vpop.permute.xlu1 %875  ;;  %v871_v28 = vpop.permute.xlu0 %870  ;;  %v920_v57 = vld [vmem:[%s3038_s3 + $0x50] sm:$0xff] }
 0x1cc   :  { %v900_v60 = vadd.f32 %v856_v39, %v788_v56  ;;  %v940_v56 = vld [vmem:[%s3038_s3 + $0xf0] sm:$0xff] }
 0x1cd   :  { %v901_v62 = vadd.f32 %v856_v39, %v789_v58  ;;  %v519_v63 = vpop.f32.mrb[24].mxu0  ;;  %v931_v39 = vld [vmem:[%s3038_s3 + $0xa8] sm:$0xff]  ;;  %v941_v58 = vld [vmem:[%s3038_s3 + $0xf8] sm:$0xff] }
 0x1ce   :  { %v1642_v1 = vpack.c.bf16 %v900_v60, %v898_v59  ;;  %v521_v2 = vpop.f32.mrb[25].mxu0  ;;  %v790_v5 = vmul.f32 %v749_v53, %v519_v63  ;;  %v921_v59 = vld [vmem:[%s3038_s3 + $0x58] sm:$0xff]  ;;  %v942_v60 = vld [vmem:[%s3038_s3 + $0x100] sm:$0xff]  ;;  %v923_v63 = vld [vmem:[%s3038_s3 + $0x68] sm:$0xff] }
 0x1cf   :  { %v1640_v4 = vpack.c.bf16 %v901_v62, %v899_v61  ;;  %v791_v6 = vmul.f32 %v749_v53, %v521_v2  ;;  %v918_v53 = vld [vmem:[%s3038_s3 + $0x40] sm:$0xff]  ;;  %v943_v62 = vld [vmem:[%s3038_s3 + $0x108] sm:$0xff]  ;;  %v945_v2 = vld [vmem:[%s3038_s3 + $0x118] sm:$0xff] }
 0x1d0   :  { %v902_v12 = vadd.f32 %v861_v3, %v790_v5  ;;  %v922_v61 = vld [vmem:[%s3038_s3 + $0x60] sm:$0xff] }
 0x1d1   :  { %v525_v7 = vpop.f32.mrb[26].mxu0  ;;  %1641 = vmatprep.subr.bf16.mxu0 %v1640_v4  ;;  %1657 = vmatprep.subr.bf16.mxu1 %v1640_v4  ;;  %v903_v15 = vadd.f32 %v861_v3, %v791_v6  ;;  %v925_v3 = vld [vmem:[%s3038_s3 + $0x78] sm:$0xff]  ;;  %v946_v4 = vld [vmem:[%s3038_s3 + $0x120] sm:$0xff]  ;;  %v947_v6 = vld [vmem:[%s3038_s3 + $0x128] sm:$0xff] }
 0x1d2   :  { %v792_v8 = vmul.f32 %v754_v51, %v525_v7  ;;  %v527_v9 = vpop.f32.mrb[27].mxu0  ;;  %1643 = vmatpush1.bf16.msra.mxu0 %v1642_v1  ;;  %1665 = vmatpush1.bf16.msra.mxu1 %v1642_v1  ;;  %v924_v1 = vld [vmem:[%s3038_s3 + $0x70] sm:$0xff]  ;;  %v926_v5 = vld [vmem:[%s3038_s3 + $0x80] sm:$0xff]  ;;  %v927_v7 = vld [vmem:[%s3038_s3 + $0x88] sm:$0xff] }
 0x1d3   :  { %v793_v10 = vmul.f32 %v754_v51, %v527_v9  ;;  %v917_v51 = vld [vmem:[%s3038_s3 + $0x38] sm:$0xff]  ;;  %v928_v9 = vld [vmem:[%s3038_s3 + $0x90] sm:$0xff] }
 0x1d4   :  { %v904_v13 = vadd.f32 %v866_v0, %v792_v8  ;;  %v948_v8 = vld [vmem:[%s3038_s3 + $0x130] sm:$0xff] }
 0x1d5   :  { %v905_v16 = vadd.f32 %v866_v0, %v793_v10  ;;  %v531_v18 = vpop.f32.mrb[28].mxu0  ;;  %v944_v0 = vld [vmem:[%s3038_s3 + $0x110] sm:$0xff]  ;;  %v949_v10 = vld [vmem:[%s3038_s3 + $0x138] sm:$0xff] }
 0x1d6   :  { %v1646_v19 = vpack.c.bf16 %v904_v13, %v902_v12  ;;  %v533_v20 = vpop.f32.mrb[29].mxu0  ;;  %v794_v22 = vmul.f32 %v759_v14, %v531_v18  ;;  %v950_v12 = vld [vmem:[%s3038_s3 + $0x140] sm:$0xff]  ;;  %v951_v13 = vld [vmem:[%s3038_s3 + $0x148] sm:$0xff] }
 0x1d7   :  { %v1644_v21 = vpack.c.bf16 %v905_v16, %v903_v15  ;;  %v795_v23 = vmul.f32 %v759_v14, %v533_v20  ;;  %v952_v14 = vld [vmem:[%s3038_s3 + $0x150] sm:$0xff]  ;;  %v953_v15 = vld [vmem:[%s3038_s3 + $0x158] sm:$0xff]  ;;  %v954_v16 = vld [vmem:[%s3038_s3 + $0x160] sm:$0xff] }
 0x1d8   :  { %v906_v30 = vadd.f32 %v871_v28, %v794_v22  ;;  %v955_v18 = vld [vmem:[%s3038_s3 + $0x168] sm:$0xff]  ;;  %v957_v20 = vld [vmem:[%s3038_s3 + $0x178] sm:$0xff] }
 0x1d9   :  { %v537_v24 = vpop.f32.mrb[30].mxu0  ;;  %1645 = vmatprep.subr.bf16.mxu0 %v1644_v21  ;;  %1658 = vmatprep.subr.bf16.mxu1 %v1644_v21  ;;  %v907_v32 = vadd.f32 %v871_v28, %v795_v23  ;;  %v958_v21 = vld [vmem:[%s3038_s3 + $0x180] sm:$0xff]  ;;  %v959_v22 = vld [vmem:[%s3038_s3 + $0x188] sm:$0xff]  ;;  %v960_v23 = vld [vmem:[%s3038_s3 + $0x190] sm:$0xff] }
 0x1da   :  { %v796_v25 = vmul.f32 %v764_v11, %v537_v24  ;;  %v539_v26 = vpop.f32.mrb[31].mxu0  ;;  %1647 = vmatpush1.bf16.msra.mxu0 %v1646_v19  ;;  %1666 = vmatpush1.bf16.msra.mxu1 %v1646_v19  ;;  %v956_v19 = vld [vmem:[%s3038_s3 + $0x170] sm:$0xff]  ;;  %v961_v24 = vld [vmem:[%s3038_s3 + $0x198] sm:$0xff] }
 0x1db   :  { %v797_v29 = vmul.f32 %v764_v11, %v539_v26  ;;  %v929_v11 = vld [vmem:[%s3038_s3 + $0x98] sm:$0xff]  ;;  %v963_v26 = vld [vmem:[%s3038_s3 + $0x1a8] sm:$0xff] }
 0x1dc   :  { %v908_v31 = vadd.f32 %v876_v27, %v796_v25  ;;  %v962_v25 = vld [vmem:[%s3038_s3 + $0x1a0] sm:$0xff]  ;;  %v965_v28 = vld [vmem:[%s3038_s3 + $0x1b8] sm:$0xff] }
 0x1dd   :  { %v909_v33 = vadd.f32 %v876_v27, %v797_v29  ;;  %v964_v27 = vld [vmem:[%s3038_s3 + $0x1b0] sm:$0xff]  ;;  %v966_v29 = vld [vmem:[%s3038_s3 + $0x1c0] sm:$0xff] }
 0x1de   :  { %v1650_v34 = vpack.c.bf16 %v908_v31, %v906_v30  ;;  %v967_v30 = vld [vmem:[%s3038_s3 + $0x1c8] sm:$0xff]  ;;  %v968_v31 = vld [vmem:[%s3038_s3 + $0x1d0] sm:$0xff] }
 0x1df   :  { %v1648_v35 = vpack.c.bf16 %v909_v33, %v907_v32  ;;  %v969_v32 = vld [vmem:[%s3038_s3 + $0x1d8] sm:$0xff]  ;;  %v970_v33 = vld [vmem:[%s3038_s3 + $0x1e0] sm:$0xff] }
 0x1e1   :  { %1649 = vmatprep.subr.bf16.mxu0 %v1648_v35  ;;  %1659 = vmatprep.subr.bf16.mxu1 %v1648_v35  ;;  %v972_v35 = vld [vmem:[%s3038_s3 + $0x1f0] sm:$0xff] }
 0x1e2   :  { %1651 = vmatpush1.bf16.msra.mxu0 %v1650_v34  ;;  %1667 = vmatpush1.bf16.msra.mxu1 %v1650_v34  ;;  %v971_v34 = vld [vmem:[%s3038_s3 + $0x1e8] sm:$0xff] }
 0x1e5   :  { %1159 = vmatmul.mubr.f32.vlgmr.msra.gmra.mrb[0].mxu1 %v930_v36  ;;  %1039 = vmatmul.mubr.f32.vlgmr.msra.gmra.mrb[32].mxu0 %v910_v37  ;;  %v973_v36 = vld [vmem:[%s3038_s3 + $0x1f8] sm:$0xff] }
 0x1e6   :  { %1164 = vmatprep.mubr.f32.mxu1 %v1705_v17  ;;  %1044 = vmatprep.mubr.f32.mxu0 %v1705_v17 }
 0x1e9   :  { %1165 = vmatmul.mubr.f32.gmra.mrb[2].mxu1 %v931_v39  ;;  %1045 = vmatmul.mubr.f32.gmra.mrb[34].mxu0 %v911_v40 }
 0x1ea   :  { %1170 = vmatprep.mubr.f32.mxu1 %v1705_v17  ;;  %1050 = vmatprep.mubr.f32.mxu0 %v1705_v17 }
 0x1ed   :  { %1171 = vmatmul.mubr.f32.gmra.mrb[4].mxu1 %v932_v41  ;;  %1051 = vmatmul.mubr.f32.gmra.mrb[36].mxu0 %v912_v38 }
 0x1ee   :  { %1176 = vmatprep.mubr.f32.mxu1 %v1705_v17  ;;  %1056 = vmatprep.mubr.f32.mxu0 %v1705_v17 }
 0x1f1   :  { %1177 = vmatmul.mubr.f32.gmra.mrb[6].mxu1 %v933_v42  ;;  %1057 = vmatmul.mubr.f32.gmra.mrb[38].mxu0 %v913_v43 }
 0x1f2   :  { %1182 = vmatprep.mubr.f32.mxu1 %v1705_v17  ;;  %1062 = vmatprep.mubr.f32.mxu0 %v1705_v17 }
 0x1f5   :  { %1183 = vmatmul.mubr.f32.gmra.mrb[8].mxu1 %v934_v44  ;;  %1063 = vmatmul.mubr.f32.gmra.mrb[40].mxu0 %v914_v45 }
 0x1f6   :  { %1188 = vmatprep.mubr.f32.mxu1 %v1705_v17  ;;  %1068 = vmatprep.mubr.f32.mxu0 %v1705_v17 }
 0x1f9   :  { %1189 = vmatmul.mubr.f32.gmra.mrb[10].mxu1 %v935_v46  ;;  %1069 = vmatmul.mubr.f32.gmra.mrb[42].mxu0 %v915_v47 }
 0x1fa   :  { %1194 = vmatprep.mubr.f32.mxu1 %v1705_v17  ;;  %1074 = vmatprep.mubr.f32.mxu0 %v1705_v17 }
 0x1fd   :  { %1195 = vmatmul.mubr.f32.gmra.mrb[12].mxu1 %v936_v48  ;;  %1075 = vmatmul.mubr.f32.gmra.mrb[44].mxu0 %v916_v49 }
 0x1fe   :  { %1200 = vmatprep.mubr.f32.mxu1 %v1705_v17  ;;  %1080 = vmatprep.mubr.f32.mxu0 %v1705_v17 }
 0x201   :  { %1201 = vmatmul.mubr.f32.gmra.mrb[14].mxu1 %v937_v50  ;;  %1081 = vmatmul.mubr.f32.gmra.mrb[46].mxu0 %v917_v51 }
 0x202   :  { %1206 = vmatprep.mubr.f32.mxu1 %v1705_v17  ;;  %1086 = vmatprep.mubr.f32.mxu0 %v1705_v17 }
 0x205   :  { %1207 = vmatmul.mubr.f32.gmra.mrb[16].mxu1 %v938_v52  ;;  %1087 = vmatmul.mubr.f32.gmra.mrb[48].mxu0 %v918_v53 }
 0x206   :  { %1212 = vmatprep.mubr.f32.mxu1 %v1705_v17  ;;  %1092 = vmatprep.mubr.f32.mxu0 %v1705_v17 }
 0x209   :  { %1213 = vmatmul.mubr.f32.gmra.mrb[18].mxu1 %v939_v54  ;;  %1093 = vmatmul.mubr.f32.gmra.mrb[50].mxu0 %v919_v55 }
 0x20a   :  { %1218 = vmatprep.mubr.f32.mxu1 %v1705_v17  ;;  %1098 = vmatprep.mubr.f32.mxu0 %v1705_v17 }
 0x20d   :  { %1219 = vmatmul.mubr.f32.gmra.mrb[20].mxu1 %v940_v56  ;;  %1099 = vmatmul.mubr.f32.gmra.mrb[52].mxu0 %v920_v57 }
 0x20e   :  { %1224 = vmatprep.mubr.f32.mxu1 %v1705_v17  ;;  %1104 = vmatprep.mubr.f32.mxu0 %v1705_v17 }
 0x211   :  { %1225 = vmatmul.mubr.f32.gmra.mrb[22].mxu1 %v941_v58  ;;  %1105 = vmatmul.mubr.f32.gmra.mrb[54].mxu0 %v921_v59 }
 0x212   :  { %1230 = vmatprep.mubr.f32.mxu1 %v1705_v17  ;;  %1110 = vmatprep.mubr.f32.mxu0 %v1705_v17 }
 0x215   :  { %1231 = vmatmul.mubr.f32.gmra.mrb[24].mxu1 %v942_v60  ;;  %1111 = vmatmul.mubr.f32.gmra.mrb[56].mxu0 %v922_v61 }
 0x216   :  { %1236 = vmatprep.mubr.f32.mxu1 %v1705_v17  ;;  %1116 = vmatprep.mubr.f32.mxu0 %v1705_v17 }
 0x219   :  { %1237 = vmatmul.mubr.f32.gmra.mrb[26].mxu1 %v943_v62  ;;  %1117 = vmatmul.mubr.f32.gmra.mrb[58].mxu0 %v923_v63 }
 0x21a   :  { %1242 = vmatprep.mubr.f32.mxu1 %v1705_v17  ;;  %1122 = vmatprep.mubr.f32.mxu0 %v1705_v17 }
 0x21d   :  { %1243 = vmatmul.mubr.f32.gmra.mrb[28].mxu1 %v944_v0  ;;  %1123 = vmatmul.mubr.f32.gmra.mrb[60].mxu0 %v924_v1 }
 0x21e   :  { %1248 = vmatprep.mubr.f32.mxu1 %v1705_v17  ;;  %1128 = vmatprep.mubr.f32.mxu0 %v1705_v17 }
 0x221   :  { %1249 = vmatmul.mubr.f32.gmra.mrb[30].mxu1 %v945_v2  ;;  %1129 = vmatmul.mubr.f32.gmra.mrb[62].mxu0 %v925_v3 }
 0x222   :  { %1254 = vmatprep.mubr.f32.mxu1 %v1705_v17  ;;  %1134 = vmatprep.mubr.f32.mxu0 %v1705_v17 }
 0x225   :  { %1255 = vmatmul.mubr.f32.gmra.mrb[32].mxu1 %v946_v4  ;;  %1135 = vmatmul.mubr.f32.gmra.mrb[64].mxu0 %v926_v5 }
 0x226   :  { %1260 = vmatprep.mubr.f32.mxu1 %v1705_v17  ;;  %1140 = vmatprep.mubr.f32.mxu0 %v1705_v17 }
 0x229   :  { %1261 = vmatmul.mubr.f32.gmra.mrb[34].mxu1 %v947_v6  ;;  %1141 = vmatmul.mubr.f32.gmra.mrb[66].mxu0 %v927_v7 }
 0x22a   :  { %1266 = vmatprep.mubr.f32.mxu1 %v1705_v17  ;;  %1146 = vmatprep.mubr.f32.mxu0 %v1705_v17 }
 0x22d   :  { %1267 = vmatmul.mubr.f32.gmra.mrb[36].mxu1 %v948_v8  ;;  %1147 = vmatmul.mubr.f32.gmra.mrb[68].mxu0 %v928_v9 }
 0x22e   :  { %1272 = vmatprep.mubr.f32.mxu1 %v1705_v17  ;;  %1152 = vmatprep.mubr.f32.mxu0 %v1705_v17 }
 0x231   :  { %1273 = vmatmul.mubr.f32.gmra.mrb[38].mxu1 %v949_v10  ;;  %1153 = vmatmul.mubr.f32.gmra.mrb[70].mxu0 %v929_v11 }
 0x232   :  { %1278 = vmatprep.mubr.f32.mxu1 %v1705_v17 }
 0x235   :  { %1279 = vmatmul.mubr.f32.gmra.mrb[40].mxu1 %v950_v12 }
 0x236   :  { %1284 = vmatprep.mubr.f32.mxu1 %v1705_v17 }
 0x239   :  { %1285 = vmatmul.mubr.f32.gmra.mrb[42].mxu1 %v951_v13 }
 0x23a   :  { %1290 = vmatprep.mubr.f32.mxu1 %v1705_v17 }
 0x23d   :  { %1291 = vmatmul.mubr.f32.gmra.mrb[44].mxu1 %v952_v14 }
 0x23e   :  { %1296 = vmatprep.mubr.f32.mxu1 %v1705_v17 }
 0x241   :  { %1297 = vmatmul.mubr.f32.gmra.mrb[46].mxu1 %v953_v15 }
 0x242   :  { %1302 = vmatprep.mubr.f32.mxu1 %v1705_v17 }
 0x245   :  { %1303 = vmatmul.mubr.f32.gmra.mrb[48].mxu1 %v954_v16 }
 0x246   :  { %1308 = vmatprep.mubr.f32.mxu1 %v1705_v17 }
 0x249   :  { %1309 = vmatmul.mubr.f32.gmra.mrb[50].mxu1 %v955_v18 }
 0x24a   :  { %1314 = vmatprep.mubr.f32.mxu1 %v1705_v17 }
 0x24d   :  { %1315 = vmatmul.mubr.f32.gmra.mrb[52].mxu1 %v956_v19 }
 0x24e   :  { %1320 = vmatprep.mubr.f32.mxu1 %v1705_v17 }
 0x251   :  { %1321 = vmatmul.mubr.f32.gmra.mrb[54].mxu1 %v957_v20 }
 0x252   :  { %1326 = vmatprep.mubr.f32.mxu1 %v1705_v17 }
 0x255   :  { %1327 = vmatmul.mubr.f32.gmra.mrb[56].mxu1 %v958_v21 }
 0x256   :  { %1332 = vmatprep.mubr.f32.mxu1 %v1705_v17 }
 0x259   :  { %1333 = vmatmul.mubr.f32.gmra.mrb[58].mxu1 %v959_v22 }
 0x25a   :  { %1338 = vmatprep.mubr.f32.mxu1 %v1705_v17 }
 0x25d   :  { %1339 = vmatmul.mubr.f32.gmra.mrb[60].mxu1 %v960_v23 }
 0x25e   :  { %1344 = vmatprep.mubr.f32.mxu1 %v1705_v17 }
 0x261   :  { %1345 = vmatmul.mubr.f32.gmra.mrb[62].mxu1 %v961_v24 }
 0x262   :  { %1350 = vmatprep.mubr.f32.mxu1 %v1705_v17 }
 0x265   :  { %1351 = vmatmul.mubr.f32.gmra.mrb[64].mxu1 %v962_v25 }
 0x266   :  { %1356 = vmatprep.mubr.f32.mxu1 %v1705_v17 }
 0x269   :  { %1357 = vmatmul.mubr.f32.gmra.mrb[66].mxu1 %v963_v26 }
 0x26a   :  { %1362 = vmatprep.mubr.f32.mxu1 %v1705_v17 }
 0x26d   :  { %1363 = vmatmul.mubr.f32.gmra.mrb[68].mxu1 %v964_v27 }
 0x26e   :  { %1368 = vmatprep.mubr.f32.mxu1 %v1705_v17 }
 0x271   :  { %1369 = vmatmul.mubr.f32.gmra.mrb[70].mxu1 %v965_v28 }
 0x272   :  { %1374 = vmatprep.mubr.f32.mxu1 %v1705_v17 }
 0x275   :  { %1375 = vmatmul.mubr.f32.gmra.mrb[72].mxu1 %v966_v29 }
 0x276   :  { %1380 = vmatprep.mubr.f32.mxu1 %v1705_v17 }
 0x279   :  { %1381 = vmatmul.mubr.f32.gmra.mrb[74].mxu1 %v967_v30 }
 0x27a   :  { %1386 = vmatprep.mubr.f32.mxu1 %v1705_v17 }
 0x27d   :  { %1387 = vmatmul.mubr.f32.gmra.mrb[76].mxu1 %v968_v31 }
 0x27e   :  { %1392 = vmatprep.mubr.f32.mxu1 %v1705_v17 }
 0x281   :  { %1393 = vmatmul.mubr.f32.gmra.mrb[78].mxu1 %v969_v32 }
 0x282   :  { %1398 = vmatprep.mubr.f32.mxu1 %v1705_v17 }
 0x285   :  { %1399 = vmatmul.mubr.f32.gmra.mrb[80].mxu1 %v970_v33 }
 0x286   :  { %1404 = vmatprep.mubr.f32.mxu1 %v1705_v17 }
 0x289   :  { %1405 = vmatmul.mubr.f32.gmra.mrb[82].mxu1 %v971_v34 }
 0x28a   :  { %1410 = vmatprep.mubr.f32.mxu1 %v1705_v17 }
 0x28d   :  { %1411 = vmatmul.mubr.f32.gmra.mrb[84].mxu1 %v972_v35 }
 0x28e   :  { %1416 = vmatprep.mubr.f32.mxu1 %v1705_v17 }
 0x291   :  { %1417 = vmatmul.mubr.f32.gmra.mrb[86].mxu1 %v973_v36 }
 0x2b8   :  { %v1160_v37 = vpop.f32.mrb[0].mxu1  ;;  %v1040_v39 = vpop.f32.mrb[32].mxu0 }
 0x2b9   :  { %1464 = vst [vmem:[%s3039_s8 + $0x140] sm:$0xff] %v1160_v37  ;;  %v1162_v40 = vpop.f32.mrb[1].mxu1  ;;  %1423 = vst [vmem:[%s3039_s8] sm:$0xff] %v1040_v39  ;;  %v1042_v41 = vpop.f32.mrb[33].mxu0 }
 0x2ba   :  { %1465 = vst.msk [vmem:[%s3039_s8 + $0x148] sm:$0xff] %vm1424_vm0, %v1162_v40  ;;  %1425 = vst.msk [vmem:[%s3039_s8 + $0x8] sm:$0xff] %vm1424_vm0, %v1042_v41 }
 0x2bc   :  { %v1166_v17 = vpop.f32.mrb[2].mxu1  ;;  %v1046_v38 = vpop.f32.mrb[34].mxu0 }
 0x2bd   :  { %1466 = vst [vmem:[%s3039_s8 + $0x150] sm:$0xff] %v1166_v17  ;;  %v1168_v42 = vpop.f32.mrb[3].mxu1  ;;  %1426 = vst [vmem:[%s3039_s8 + $0x10] sm:$0xff] %v1046_v38  ;;  %v1048_v43 = vpop.f32.mrb[35].mxu0 }
 0x2be   :  { %1467 = vst.msk [vmem:[%s3039_s8 + $0x158] sm:$0xff] %vm1424_vm0, %v1168_v42  ;;  %1427 = vst.msk [vmem:[%s3039_s8 + $0x18] sm:$0xff] %vm1424_vm0, %v1048_v43 }
 0x2c0   :  { %v1172_v44 = vpop.f32.mrb[4].mxu1  ;;  %v1052_v45 = vpop.f32.mrb[36].mxu0 }
 0x2c1   :  { %1468 = vst [vmem:[%s3039_s8 + $0x160] sm:$0xff] %v1172_v44  ;;  %v1174_v46 = vpop.f32.mrb[5].mxu1  ;;  %1428 = vst [vmem:[%s3039_s8 + $0x20] sm:$0xff] %v1052_v45  ;;  %v1054_v47 = vpop.f32.mrb[37].mxu0 }
 0x2c2   :  { %1469 = vst.msk [vmem:[%s3039_s8 + $0x168] sm:$0xff] %vm1424_vm0, %v1174_v46  ;;  %1429 = vst.msk [vmem:[%s3039_s8 + $0x28] sm:$0xff] %vm1424_vm0, %v1054_v47 }
 0x2c4   :  { %v1178_v48 = vpop.f32.mrb[6].mxu1  ;;  %v1058_v49 = vpop.f32.mrb[38].mxu0 }
 0x2c5   :  { %1470 = vst [vmem:[%s3039_s8 + $0x170] sm:$0xff] %v1178_v48  ;;  %v1180_v50 = vpop.f32.mrb[7].mxu1  ;;  %1430 = vst [vmem:[%s3039_s8 + $0x30] sm:$0xff] %v1058_v49  ;;  %v1060_v51 = vpop.f32.mrb[39].mxu0 }
 0x2c6   :  { %1471 = vst.msk [vmem:[%s3039_s8 + $0x178] sm:$0xff] %vm1424_vm0, %v1180_v50  ;;  %1431 = vst.msk [vmem:[%s3039_s8 + $0x38] sm:$0xff] %vm1424_vm0, %v1060_v51 }
 0x2c8   :  { %v1184_v52 = vpop.f32.mrb[8].mxu1  ;;  %v1064_v53 = vpop.f32.mrb[40].mxu0 }
 0x2c9   :  { %1472 = vst [vmem:[%s3039_s8 + $0x180] sm:$0xff] %v1184_v52  ;;  %v1186_v54 = vpop.f32.mrb[9].mxu1  ;;  %1432 = vst [vmem:[%s3039_s8 + $0x40] sm:$0xff] %v1064_v53  ;;  %v1066_v55 = vpop.f32.mrb[41].mxu0 }
 0x2ca   :  { %1473 = vst.msk [vmem:[%s3039_s8 + $0x188] sm:$0xff] %vm1424_vm0, %v1186_v54  ;;  %1433 = vst.msk [vmem:[%s3039_s8 + $0x48] sm:$0xff] %vm1424_vm0, %v1066_v55 }
 0x2cc   :  { %v1190_v56 = vpop.f32.mrb[10].mxu1  ;;  %v1070_v57 = vpop.f32.mrb[42].mxu0 }
 0x2cd   :  { %1474 = vst [vmem:[%s3039_s8 + $0x190] sm:$0xff] %v1190_v56  ;;  %v1192_v58 = vpop.f32.mrb[11].mxu1  ;;  %1434 = vst [vmem:[%s3039_s8 + $0x50] sm:$0xff] %v1070_v57  ;;  %v1072_v59 = vpop.f32.mrb[43].mxu0 }
 0x2ce   :  { %1475 = vst.msk [vmem:[%s3039_s8 + $0x198] sm:$0xff] %vm1424_vm0, %v1192_v58  ;;  %1435 = vst.msk [vmem:[%s3039_s8 + $0x58] sm:$0xff] %vm1424_vm0, %v1072_v59 }
 0x2d0   :  { %v1196_v60 = vpop.f32.mrb[12].mxu1  ;;  %v1076_v61 = vpop.f32.mrb[44].mxu0 }
 0x2d1   :  { %1476 = vst [vmem:[%s3039_s8 + $0x1a0] sm:$0xff] %v1196_v60  ;;  %v1198_v62 = vpop.f32.mrb[13].mxu1  ;;  %1436 = vst [vmem:[%s3039_s8 + $0x60] sm:$0xff] %v1076_v61  ;;  %v1078_v63 = vpop.f32.mrb[45].mxu0 }
 0x2d2   :  { %1477 = vst.msk [vmem:[%s3039_s8 + $0x1a8] sm:$0xff] %vm1424_vm0, %v1198_v62  ;;  %1437 = vst.msk [vmem:[%s3039_s8 + $0x68] sm:$0xff] %vm1424_vm0, %v1078_v63 }
 0x2d4   :  { %v1202_v0 = vpop.f32.mrb[14].mxu1  ;;  %v1082_v1 = vpop.f32.mrb[46].mxu0 }
 0x2d5   :  { %1478 = vst [vmem:[%s3039_s8 + $0x1b0] sm:$0xff] %v1202_v0  ;;  %v1204_v2 = vpop.f32.mrb[15].mxu1  ;;  %1438 = vst [vmem:[%s3039_s8 + $0x70] sm:$0xff] %v1082_v1  ;;  %v1084_v3 = vpop.f32.mrb[47].mxu0 }
 0x2d6   :  { %1479 = vst.msk [vmem:[%s3039_s8 + $0x1b8] sm:$0xff] %vm1424_vm0, %v1204_v2  ;;  %1439 = vst.msk [vmem:[%s3039_s8 + $0x78] sm:$0xff] %vm1424_vm0, %v1084_v3 }
 0x2d8   :  { %v1208_v4 = vpop.f32.mrb[16].mxu1  ;;  %v1088_v5 = vpop.f32.mrb[48].mxu0 }
 0x2d9   :  { %1480 = vst [vmem:[%s3039_s8 + $0x1c0] sm:$0xff] %v1208_v4  ;;  %v1210_v6 = vpop.f32.mrb[17].mxu1  ;;  %1440 = vst [vmem:[%s3039_s8 + $0x80] sm:$0xff] %v1088_v5  ;;  %v1090_v7 = vpop.f32.mrb[49].mxu0 }
 0x2da   :  { %1481 = vst.msk [vmem:[%s3039_s8 + $0x1c8] sm:$0xff] %vm1424_vm0, %v1210_v6  ;;  %1441 = vst.msk [vmem:[%s3039_s8 + $0x88] sm:$0xff] %vm1424_vm0, %v1090_v7 }
 0x2dc   :  { %v1214_v8 = vpop.f32.mrb[18].mxu1  ;;  %v1094_v9 = vpop.f32.mrb[50].mxu0 }
 0x2dd   :  { %1482 = vst [vmem:[%s3039_s8 + $0x1d0] sm:$0xff] %v1214_v8  ;;  %v1216_v10 = vpop.f32.mrb[19].mxu1  ;;  %1442 = vst [vmem:[%s3039_s8 + $0x90] sm:$0xff] %v1094_v9  ;;  %v1096_v11 = vpop.f32.mrb[51].mxu0 }
 0x2de   :  { %1483 = vst.msk [vmem:[%s3039_s8 + $0x1d8] sm:$0xff] %vm1424_vm0, %v1216_v10  ;;  %1443 = vst.msk [vmem:[%s3039_s8 + $0x98] sm:$0xff] %vm1424_vm0, %v1096_v11 }
 0x2e0   :  { %v1220_v12 = vpop.f32.mrb[20].mxu1  ;;  %v1100_v13 = vpop.f32.mrb[52].mxu0 }
 0x2e1   :  { %1484 = vst [vmem:[%s3039_s8 + $0x1e0] sm:$0xff] %v1220_v12  ;;  %v1222_v14 = vpop.f32.mrb[21].mxu1  ;;  %1444 = vst [vmem:[%s3039_s8 + $0xa0] sm:$0xff] %v1100_v13  ;;  %v1102_v15 = vpop.f32.mrb[53].mxu0 }
 0x2e2   :  { %1485 = vst.msk [vmem:[%s3039_s8 + $0x1e8] sm:$0xff] %vm1424_vm0, %v1222_v14  ;;  %1445 = vst.msk [vmem:[%s3039_s8 + $0xa8] sm:$0xff] %vm1424_vm0, %v1102_v15 }
 0x2e4   :  { %v1226_v16 = vpop.f32.mrb[22].mxu1  ;;  %v1106_v18 = vpop.f32.mrb[54].mxu0 }
 0x2e5   :  { %1486 = vst [vmem:[%s3039_s8 + $0x1f0] sm:$0xff] %v1226_v16  ;;  %v1228_v19 = vpop.f32.mrb[23].mxu1  ;;  %1446 = vst [vmem:[%s3039_s8 + $0xb0] sm:$0xff] %v1106_v18  ;;  %v1108_v20 = vpop.f32.mrb[55].mxu0 }
 0x2e6   :  { %1487 = vst.msk [vmem:[%s3039_s8 + $0x1f8] sm:$0xff] %vm1424_vm0, %v1228_v19  ;;  %1447 = vst.msk [vmem:[%s3039_s8 + $0xb8] sm:$0xff] %vm1424_vm0, %v1108_v20 }
 0x2e8   :  { %v1232_v21 = vpop.f32.mrb[24].mxu1  ;;  %v1112_v22 = vpop.f32.mrb[56].mxu0 }
 0x2e9   :  { %1488 = vst [vmem:[%s3039_s8 + $0x200] sm:$0xff] %v1232_v21  ;;  %v1234_v23 = vpop.f32.mrb[25].mxu1  ;;  %1448 = vst [vmem:[%s3039_s8 + $0xc0] sm:$0xff] %v1112_v22  ;;  %v1114_v24 = vpop.f32.mrb[57].mxu0 }
 0x2ea   :  { %1489 = vst.msk [vmem:[%s3039_s8 + $0x208] sm:$0xff] %vm1424_vm0, %v1234_v23  ;;  %1449 = vst.msk [vmem:[%s3039_s8 + $0xc8] sm:$0xff] %vm1424_vm0, %v1114_v24 }
 0x2ec   :  { %v1238_v25 = vpop.f32.mrb[26].mxu1  ;;  %v1118_v26 = vpop.f32.mrb[58].mxu0 }
 0x2ed   :  { %1490 = vst [vmem:[%s3039_s8 + $0x210] sm:$0xff] %v1238_v25  ;;  %v1240_v27 = vpop.f32.mrb[27].mxu1  ;;  %1450 = vst [vmem:[%s3039_s8 + $0xd0] sm:$0xff] %v1118_v26  ;;  %v1120_v28 = vpop.f32.mrb[59].mxu0 }
 0x2ee   :  { %1491 = vst.msk [vmem:[%s3039_s8 + $0x218] sm:$0xff] %vm1424_vm0, %v1240_v27  ;;  %1451 = vst.msk [vmem:[%s3039_s8 + $0xd8] sm:$0xff] %vm1424_vm0, %v1120_v28 }
 0x2f0   :  { %v1244_v29 = vpop.f32.mrb[28].mxu1  ;;  %v1124_v30 = vpop.f32.mrb[60].mxu0 }
 0x2f1   :  { %1492 = vst [vmem:[%s3039_s8 + $0x220] sm:$0xff] %v1244_v29  ;;  %v1246_v31 = vpop.f32.mrb[29].mxu1  ;;  %1452 = vst [vmem:[%s3039_s8 + $0xe0] sm:$0xff] %v1124_v30  ;;  %v1126_v32 = vpop.f32.mrb[61].mxu0 }
 0x2f2   :  { %1493 = vst.msk [vmem:[%s3039_s8 + $0x228] sm:$0xff] %vm1424_vm0, %v1246_v31  ;;  %1453 = vst.msk [vmem:[%s3039_s8 + $0xe8] sm:$0xff] %vm1424_vm0, %v1126_v32 }
 0x2f4   :  { %v1250_v33 = vpop.f32.mrb[30].mxu1  ;;  %v1130_v34 = vpop.f32.mrb[62].mxu0 }
 0x2f5   :  { %1494 = vst [vmem:[%s3039_s8 + $0x230] sm:$0xff] %v1250_v33  ;;  %v1252_v35 = vpop.f32.mrb[31].mxu1  ;;  %1454 = vst [vmem:[%s3039_s8 + $0xf0] sm:$0xff] %v1130_v34  ;;  %v1132_v36 = vpop.f32.mrb[63].mxu0 }
 0x2f6   :  { %1495 = vst.msk [vmem:[%s3039_s8 + $0x238] sm:$0xff] %vm1424_vm0, %v1252_v35  ;;  %1455 = vst.msk [vmem:[%s3039_s8 + $0xf8] sm:$0xff] %vm1424_vm0, %v1132_v36 }
 0x2f8   :  { %v1256_v37 = vpop.f32.mrb[32].mxu1  ;;  %v1136_v39 = vpop.f32.mrb[64].mxu0 }
 0x2f9   :  { %1496 = vst [vmem:[%s3039_s8 + $0x240] sm:$0xff] %v1256_v37  ;;  %v1258_v40 = vpop.f32.mrb[33].mxu1  ;;  %1456 = vst [vmem:[%s3039_s8 + $0x100] sm:$0xff] %v1136_v39  ;;  %v1138_v41 = vpop.f32.mrb[65].mxu0 }
 0x2fa   :  { %1497 = vst.msk [vmem:[%s3039_s8 + $0x248] sm:$0xff] %vm1424_vm0, %v1258_v40  ;;  %1457 = vst.msk [vmem:[%s3039_s8 + $0x108] sm:$0xff] %vm1424_vm0, %v1138_v41 }
 0x2fc   :  { %v1262_v17 = vpop.f32.mrb[34].mxu1  ;;  %v1142_v38 = vpop.f32.mrb[66].mxu0 }
 0x2fd   :  { %1498 = vst [vmem:[%s3039_s8 + $0x250] sm:$0xff] %v1262_v17  ;;  %v1264_v42 = vpop.f32.mrb[35].mxu1  ;;  %1458 = vst [vmem:[%s3039_s8 + $0x110] sm:$0xff] %v1142_v38  ;;  %v1144_v43 = vpop.f32.mrb[67].mxu0 }
 0x2fe   :  { %1499 = vst.msk [vmem:[%s3039_s8 + $0x258] sm:$0xff] %vm1424_vm0, %v1264_v42  ;;  %1459 = vst.msk [vmem:[%s3039_s8 + $0x118] sm:$0xff] %vm1424_vm0, %v1144_v43 }
 0x300   :  { %v1268_v44 = vpop.f32.mrb[36].mxu1  ;;  %v1148_v45 = vpop.f32.mrb[68].mxu0 }
 0x301   :  { %1500 = vst [vmem:[%s3039_s8 + $0x260] sm:$0xff] %v1268_v44  ;;  %v1270_v46 = vpop.f32.mrb[37].mxu1  ;;  %1460 = vst [vmem:[%s3039_s8 + $0x120] sm:$0xff] %v1148_v45  ;;  %v1150_v47 = vpop.f32.mrb[69].mxu0 }
 0x302   :  { %1501 = vst.msk [vmem:[%s3039_s8 + $0x268] sm:$0xff] %vm1424_vm0, %v1270_v46  ;;  %1461 = vst.msk [vmem:[%s3039_s8 + $0x128] sm:$0xff] %vm1424_vm0, %v1150_v47 }
 0x304   :  { %v1274_v48 = vpop.f32.mrb[38].mxu1  ;;  %v1154_v49 = vpop.f32.mrb[70].mxu0 }
 0x305   :  { %1502 = vst [vmem:[%s3039_s8 + $0x270] sm:$0xff] %v1274_v48  ;;  %v1276_v50 = vpop.f32.mrb[39].mxu1  ;;  %1462 = vst [vmem:[%s3039_s8 + $0x130] sm:$0xff] %v1154_v49  ;;  %v1156_v51 = vpop.f32.mrb[71].mxu0 }
 0x306   :  { %1503 = vst.msk [vmem:[%s3039_s8 + $0x278] sm:$0xff] %vm1424_vm0, %v1276_v50  ;;  %1463 = vst.msk [vmem:[%s3039_s8 + $0x138] sm:$0xff] %vm1424_vm0, %v1156_v51 }
 0x308   :  { %v1280_v52 = vpop.f32.mrb[40].mxu1 }
 0x309   :  { %1504 = vst [vmem:[%s3039_s8 + $0x280] sm:$0xff] %v1280_v52  ;;  %v1282_v53 = vpop.f32.mrb[41].mxu1 }
 0x30a   :  { %1505 = vst.msk [vmem:[%s3039_s8 + $0x288] sm:$0xff] %vm1424_vm0, %v1282_v53 }
 0x30c   :  { %v1286_v54 = vpop.f32.mrb[42].mxu1 }
 0x30d   :  { %1506 = vst [vmem:[%s3039_s8 + $0x290] sm:$0xff] %v1286_v54  ;;  %v1288_v55 = vpop.f32.mrb[43].mxu1 }
 0x30e   :  { %1507 = vst.msk [vmem:[%s3039_s8 + $0x298] sm:$0xff] %vm1424_vm0, %v1288_v55 }
 0x310   :  { %v1292_v56 = vpop.f32.mrb[44].mxu1 }
 0x311   :  { %1508 = vst [vmem:[%s3039_s8 + $0x2a0] sm:$0xff] %v1292_v56  ;;  %v1294_v57 = vpop.f32.mrb[45].mxu1 }
 0x312   :  { %1509 = vst.msk [vmem:[%s3039_s8 + $0x2a8] sm:$0xff] %vm1424_vm0, %v1294_v57 }
 0x314   :  { %v1298_v58 = vpop.f32.mrb[46].mxu1 }
 0x315   :  { %1510 = vst [vmem:[%s3039_s8 + $0x2b0] sm:$0xff] %v1298_v58  ;;  %v1300_v59 = vpop.f32.mrb[47].mxu1 }
 0x316   :  { %1511 = vst.msk [vmem:[%s3039_s8 + $0x2b8] sm:$0xff] %vm1424_vm0, %v1300_v59 }
 0x318   :  { %v1304_v60 = vpop.f32.mrb[48].mxu1 }
 0x319   :  { %1512 = vst [vmem:[%s3039_s8 + $0x2c0] sm:$0xff] %v1304_v60  ;;  %v1306_v61 = vpop.f32.mrb[49].mxu1 }
 0x31a   :  { %1513 = vst.msk [vmem:[%s3039_s8 + $0x2c8] sm:$0xff] %vm1424_vm0, %v1306_v61 }
 0x31c   :  { %v1310_v62 = vpop.f32.mrb[50].mxu1 }
 0x31d   :  { %1514 = vst [vmem:[%s3039_s8 + $0x2d0] sm:$0xff] %v1310_v62  ;;  %v1312_v63 = vpop.f32.mrb[51].mxu1 }
 0x31e   :  { %1515 = vst.msk [vmem:[%s3039_s8 + $0x2d8] sm:$0xff] %vm1424_vm0, %v1312_v63 }
 0x320   :  { %v1316_v0 = vpop.f32.mrb[52].mxu1 }
 0x321   :  { %1516 = vst [vmem:[%s3039_s8 + $0x2e0] sm:$0xff] %v1316_v0  ;;  %v1318_v1 = vpop.f32.mrb[53].mxu1 }
 0x322   :  { %1517 = vst.msk [vmem:[%s3039_s8 + $0x2e8] sm:$0xff] %vm1424_vm0, %v1318_v1 }
 0x324   :  { %v1322_v2 = vpop.f32.mrb[54].mxu1 }
 0x325   :  { %1518 = vst [vmem:[%s3039_s8 + $0x2f0] sm:$0xff] %v1322_v2  ;;  %v1324_v3 = vpop.f32.mrb[55].mxu1 }
 0x326   :  { %1519 = vst.msk [vmem:[%s3039_s8 + $0x2f8] sm:$0xff] %vm1424_vm0, %v1324_v3 }
 0x328   :  { %v1328_v4 = vpop.f32.mrb[56].mxu1 }
 0x329   :  { %1520 = vst [vmem:[%s3039_s8 + $0x300] sm:$0xff] %v1328_v4  ;;  %v1330_v5 = vpop.f32.mrb[57].mxu1 }
 0x32a   :  { %1521 = vst.msk [vmem:[%s3039_s8 + $0x308] sm:$0xff] %vm1424_vm0, %v1330_v5 }
 0x32c   :  { %v1334_v6 = vpop.f32.mrb[58].mxu1 }
 0x32d   :  { %1522 = vst [vmem:[%s3039_s8 + $0x310] sm:$0xff] %v1334_v6  ;;  %v1336_v7 = vpop.f32.mrb[59].mxu1 }
 0x32e   :  { %1523 = vst.msk [vmem:[%s3039_s8 + $0x318] sm:$0xff] %vm1424_vm0, %v1336_v7 }
 0x330   :  { %v1340_v8 = vpop.f32.mrb[60].mxu1 }
 0x331   :  { %1524 = vst [vmem:[%s3039_s8 + $0x320] sm:$0xff] %v1340_v8  ;;  %v1342_v9 = vpop.f32.mrb[61].mxu1 }
 0x332   :  { %1525 = vst.msk [vmem:[%s3039_s8 + $0x328] sm:$0xff] %vm1424_vm0, %v1342_v9 }
 0x334   :  { %v1346_v10 = vpop.f32.mrb[62].mxu1 }
 0x335   :  { %1526 = vst [vmem:[%s3039_s8 + $0x330] sm:$0xff] %v1346_v10  ;;  %v1348_v11 = vpop.f32.mrb[63].mxu1 }
 0x336   :  { %1527 = vst.msk [vmem:[%s3039_s8 + $0x338] sm:$0xff] %vm1424_vm0, %v1348_v11 }
 0x338   :  { %v1352_v12 = vpop.f32.mrb[64].mxu1 }
 0x339   :  { %1528 = vst [vmem:[%s3039_s8 + $0x340] sm:$0xff] %v1352_v12  ;;  %v1354_v13 = vpop.f32.mrb[65].mxu1 }
 0x33a   :  { %1529 = vst.msk [vmem:[%s3039_s8 + $0x348] sm:$0xff] %vm1424_vm0, %v1354_v13 }
 0x33c   :  { %v1358_v14 = vpop.f32.mrb[66].mxu1 }
 0x33d   :  { %1530 = vst [vmem:[%s3039_s8 + $0x350] sm:$0xff] %v1358_v14  ;;  %v1360_v15 = vpop.f32.mrb[67].mxu1 }
 0x33e   :  { %1531 = vst.msk [vmem:[%s3039_s8 + $0x358] sm:$0xff] %vm1424_vm0, %v1360_v15 }
 0x340   :  { %v1364_v16 = vpop.f32.mrb[68].mxu1 }
 0x341   :  { %1532 = vst [vmem:[%s3039_s8 + $0x360] sm:$0xff] %v1364_v16  ;;  %v1366_v18 = vpop.f32.mrb[69].mxu1 }
 0x342   :  { %1533 = vst.msk [vmem:[%s3039_s8 + $0x368] sm:$0xff] %vm1424_vm0, %v1366_v18 }
 0x344   :  { %v1370_v19 = vpop.f32.mrb[70].mxu1 }
 0x345   :  { %1534 = vst [vmem:[%s3039_s8 + $0x370] sm:$0xff] %v1370_v19  ;;  %v1372_v20 = vpop.f32.mrb[71].mxu1 }
 0x346   :  { %1535 = vst.msk [vmem:[%s3039_s8 + $0x378] sm:$0xff] %vm1424_vm0, %v1372_v20 }
 0x348   :  { %v1376_v21 = vpop.f32.mrb[72].mxu1 }
 0x349   :  { %1536 = vst [vmem:[%s3039_s8 + $0x380] sm:$0xff] %v1376_v21  ;;  %v1378_v22 = vpop.f32.mrb[73].mxu1 }
 0x34a   :  { %1537 = vst.msk [vmem:[%s3039_s8 + $0x388] sm:$0xff] %vm1424_vm0, %v1378_v22 }
 0x34c   :  { %v1382_v23 = vpop.f32.mrb[74].mxu1 }
 0x34d   :  { %1538 = vst [vmem:[%s3039_s8 + $0x390] sm:$0xff] %v1382_v23  ;;  %v1384_v24 = vpop.f32.mrb[75].mxu1 }
 0x34e   :  { %1539 = vst.msk [vmem:[%s3039_s8 + $0x398] sm:$0xff] %vm1424_vm0, %v1384_v24 }
 0x350   :  { %v1388_v25 = vpop.f32.mrb[76].mxu1 }
 0x351   :  { %1540 = vst [vmem:[%s3039_s8 + $0x3a0] sm:$0xff] %v1388_v25  ;;  %v1390_v26 = vpop.f32.mrb[77].mxu1 }
 0x352   :  { %1541 = vst.msk [vmem:[%s3039_s8 + $0x3a8] sm:$0xff] %vm1424_vm0, %v1390_v26 }
 0x354   :  { %v1394_v27 = vpop.f32.mrb[78].mxu1 }
 0x355   :  { %1542 = vst [vmem:[%s3039_s8 + $0x3b0] sm:$0xff] %v1394_v27  ;;  %v1396_v28 = vpop.f32.mrb[79].mxu1 }
 0x356   :  { %1543 = vst.msk [vmem:[%s3039_s8 + $0x3b8] sm:$0xff] %vm1424_vm0, %v1396_v28 }
 0x358   :  { %v1400_v29 = vpop.f32.mrb[80].mxu1 }
 0x359   :  { %1544 = vst [vmem:[%s3039_s8 + $0x3c0] sm:$0xff] %v1400_v29  ;;  %v1402_v30 = vpop.f32.mrb[81].mxu1 }
 0x35a   :  { %1545 = vst.msk [vmem:[%s3039_s8 + $0x3c8] sm:$0xff] %vm1424_vm0, %v1402_v30 }
 0x35c   :  { %v1406_v31 = vpop.f32.mrb[82].mxu1 }
 0x35d   :  { %1546 = vst [vmem:[%s3039_s8 + $0x3d0] sm:$0xff] %v1406_v31  ;;  %v1408_v32 = vpop.f32.mrb[83].mxu1 }
 0x35e   :  { %1547 = vst.msk [vmem:[%s3039_s8 + $0x3d8] sm:$0xff] %vm1424_vm0, %v1408_v32 }
 0x360   :  { %v1412_v33 = vpop.f32.mrb[84].mxu1 }
 0x361   :  { %1548 = vst [vmem:[%s3039_s8 + $0x3e0] sm:$0xff] %v1412_v33  ;;  %v1414_v34 = vpop.f32.mrb[85].mxu1 }
 0x362   :  { %1549 = vst.msk [vmem:[%s3039_s8 + $0x3e8] sm:$0xff] %vm1424_vm0, %v1414_v34 }
 0x364   :  { %v1418_v35 = vpop.f32.mrb[86].mxu1 }
 0x365   :  { %1550 = vst [vmem:[%s3039_s8 + $0x3f0] sm:$0xff] %v1418_v35  ;;  %v1420_v36 = vpop.f32.mrb[87].mxu1 }
 0x366   :  { %1551 = vst.msk [vmem:[%s3039_s8 + $0x3f8] sm:$0xff] %vm1424_vm0, %v1420_v36 }

</bundles_post_ra>
